<compile_context>
chip_gen: v5e
topology: v5e:2x2
jax: 0.10.0
libtpu: 0.0.40
codegen_flags: <defaults>
</compile_context>

<pallas_src>
import numpy as np
import jax
import jax.numpy as jnp
from jax.experimental import pallas as pl
from jax.experimental.pallas import tpu as pltpu

# ----------------- small hyper-parameters (scaled-down module defaults) -----------------
HOP = 64            # hop_length
N_FFT = 256         # n_fft
WIN = 256           # window_size
DIM = 128           # dim
OUT_CHANNELS = 256  # out_channels (!= dim -> weight-normed output conv)
N_FREQ = N_FFT // 2 + 1          # stft_dim = 129
FEAT = 2 * N_FREQ                # 258 = real + imag channels
EPS = 1e-6
MAX_F_TILE = 512                 # frames per grid step (multiple of 128 -> lane-dense stores)

assert WIN == N_FFT, "kernel assumes window_size == n_fft (true for the module defaults)"
assert N_FFT % HOP == 0, "overlap framing assumes n_fft % hop_length == 0"
R_OVR = N_FFT // HOP             # overlap factor (4)


def _round_up(x, m):
    return (x + m - 1) // m * m


def _cdiv(a, b):
    return (a + b - 1) // b


# ----------------------------------- fused Pallas kernel --------------------------------
def _fused_encoder_kernel(sig_ref, wc_ref, b_in_ref, g_in_ref,
                          w_out_ref, b_out_ref, out_ref):
    # sig_ref:   (1, n_hops, HOP) bf16  hop-chunked padded signal of this batch (VMEM-resident)
    # wc_ref:    (N_FFT, DIM)     bf16  hann-windowed DFT basis folded with input_proj weight
    # b_in_ref:  (1, DIM)         f32   input_proj bias
    # g_in_ref:  (1, DIM)         f32   input_norm (RMSNorm) gamma
    # w_out_ref: (OUT, DIM)       bf16  weight-normed output_proj (final-norm gamma folded in),
    #                                   channels-major so the 2nd matmul emits NCT layout directly
    # b_out_ref: (OUT, 1)         f32
    # out_ref:   (1, OUT, TF)           channels-major frame tile (TF % 128 == 0, lane-dense)
    tf = out_ref.shape[2]
    f0 = pl.multiple_of(pl.program_id(1) * tf, tf)

    # Frame extraction in VMEM: one sublane-aligned load of the signal window, then the 4
    # hop-shifted slices concatenated along lanes.
    # frames[i, :] == padded_signal[(f0+i)*HOP : (f0+i)*HOP + N_FFT]
    win = sig_ref[0, pl.ds(f0, tf + 8), :]                                   # (tf+8, HOP)
    frames = jnp.concatenate([win[r:r + tf, :] for r in range(R_OVR)], axis=-1)  # (tf, N_FFT)

    # 1+2) STFT + input_proj (single MXU contraction, f32 accumulation).
    y = jnp.dot(frames, wc_ref[...], preferred_element_type=jnp.float32) + b_in_ref[...]
    # 3) input_norm (RMSNorm, f32 on VPU/EUP).
    y = y * jax.lax.rsqrt(jnp.mean(y * y, axis=-1, keepdims=True) + EPS) * g_in_ref[...]
    # 4) TODO(synk): ConformerBackbone definition not provided in source; identity here.
    # 5) final RMSNorm (gamma folded into w_out).
    xn = y * jax.lax.rsqrt(jnp.mean(y * y, axis=-1, keepdims=True) + EPS)
    # 6) weight-normed output_proj, emitted directly in (channels, frames) order
    #    (fused NCT transpose: transpose rides the otherwise-idle XLU slot).
    xnt = xn.T.astype(jnp.bfloat16)                                          # (DIM, tf)
    out_t = jnp.dot(w_out_ref[...], xnt, preferred_element_type=jnp.float32) + b_out_ref[...]
    out_ref[0] = out_t.astype(out_ref.dtype)


# ----------------------------------- parameter setup ------------------------------------
def make_params(key):
    k1, k2 = jax.random.split(key, 2)
    # init_weights: Conv1d weights ~ trunc_normal(std=0.02) (truncation at +-2.0 is a
    # no-op at std=0.02, so a plain normal is numerically equivalent), bias = 0.
    w_in = jax.random.normal(k1, (DIM, FEAT), jnp.float32) * 0.02   # Conv1d (out,in,1) squeezed
    b_in = jnp.zeros((DIM,), jnp.float32)
    g_in_norm = jnp.ones((DIM,), jnp.float32)                       # RMSNorm weight (input_norm)
    g_fin_norm = jnp.ones((DIM,), jnp.float32)                      # RMSNorm weight (norm)
    # output_proj = weight_norm(Conv1d(dim, out_channels, 1)): at init weight == v
    v = jax.random.normal(k2, (OUT_CHANNELS, DIM), jnp.float32) * 0.02
    g = jnp.linalg.norm(v, axis=1, keepdims=True)                   # weight_norm init: g = ||v||
    w_out = g * v / jnp.linalg.norm(v, axis=1, keepdims=True)
    b_out = jnp.zeros((OUT_CHANNELS,), jnp.float32)
    return dict(w_in=w_in, b_in=b_in, g_in=g_in_norm, g_fin=g_fin_norm,
                w_out=w_out, b_out=b_out)


def make_dft_basis():
    # torch.stft: X[k] = sum_n w[n] x[n] exp(-i 2*pi*k*n/N) -> real = sum w x cos,
    # imag = -sum w x sin.
    n = np.arange(N_FFT)[:, None].astype(np.float64)
    k = np.arange(N_FREQ)[None, :].astype(np.float64)
    ang = 2.0 * np.pi * n * k / N_FFT
    window = 0.5 - 0.5 * np.cos(2.0 * np.pi * np.arange(WIN) / WIN)   # hann (periodic)
    basis = np.concatenate([np.cos(ang), -np.sin(ang)], axis=1)       # (N_FFT, FEAT)
    basis = window[:, None] * basis
    return jnp.asarray(basis, jnp.float32), jnp.asarray(window, jnp.float32)


def prepare_kernel_params(params, basis):
    """Fold linear stages into lane-aligned bf16 MXU operands (done once, exact algebra)."""
    wc = (basis @ params["w_in"].T).astype(jnp.bfloat16)                        # (N_FFT, DIM)
    b_in = params["b_in"][None, :].astype(jnp.float32)                          # (1, DIM)
    g_in = params["g_in"][None, :].astype(jnp.float32)                          # (1, DIM)
    w_out_oc = (params["w_out"] * params["g_fin"][None, :]).astype(jnp.bfloat16)  # (OUT, DIM)
    b_out = params["b_out"][:, None].astype(jnp.float32)                        # (OUT, 1)
    return dict(wc=wc, b_in=b_in, g_in=g_in, w_out_oc=w_out_oc, b_out=b_out)


# ------------------------------------- forward pass -------------------------------------
def conformer_encoder_stft_forward(x, kp, out_dtype=jnp.bfloat16):
    """x: (B, 1, T) float32  ->  (B, OUT_CHANNELS, num_frames) out_dtype (bf16 by default)."""
    B, _, T = x.shape
    pad = (WIN - HOP) // 2
    Tp = T + 2 * pad
    F = (Tp - N_FFT) // HOP + 1

    # Frame-tile size: multiple of 128 (lane-dense channels-major stores), up to MAX_F_TILE.
    F_pad = _round_up(F, 128)
    tf = min(MAX_F_TILE, F_pad)
    if B * _cdiv(F_pad, tf) < 2 and F_pad > 128:
        tf = _round_up(_cdiv(F_pad, 2), 128)       # >= 2 grid programs -> both v7x TensorCores
    F_pad = _round_up(F_pad, tf)
    n_tiles = F_pad // tf

    # Hop-chunked padded signal in bf16: the only XLA pre-pass (tiny pad + cast + reshape).
    # No (B*F, N_FFT) frames array is ever materialized in HBM (frames are built in VMEM).
    n_hops = F_pad + 8                              # +3 hop overlap headroom, sublane-aligned
    xb = x[:, 0, :]                                 # squeeze(1)
    sig = jnp.pad(xb, ((0, 0), (pad, n_hops * HOP - Tp + pad))).astype(jnp.bfloat16)
    sig = sig.reshape(B, n_hops, HOP)

    out = pl.pallas_call(
        _fused_encoder_kernel,
        out_shape=jax.ShapeDtypeStruct((B, OUT_CHANNELS, F_pad), out_dtype),
        grid=(B, n_tiles),
        in_specs=[
            # whole per-batch signal stays VMEM-resident; re-DMA'd only when b changes
            pl.BlockSpec((1, n_hops, HOP), lambda b, j: (b, 0, 0)),
            pl.BlockSpec((N_FFT, DIM), lambda b, j: (0, 0)),
            pl.BlockSpec((1, DIM), lambda b, j: (0, 0)),
            pl.BlockSpec((1, DIM), lambda b, j: (0, 0)),
            pl.BlockSpec((OUT_CHANNELS, DIM), lambda b, j: (0, 0)),
            pl.BlockSpec((OUT_CHANNELS, 1), lambda b, j: (0, 0)),
        ],
        out_specs=pl.BlockSpec((1, OUT_CHANNELS, tf), lambda b, j: (b, 0, j)),
        compiler_params=pltpu.CompilerParams(
            dimension_semantics=("parallel", "parallel")),
    )(sig, kp["wc"], kp["b_in"], kp["g_in"], kp["w_out_oc"], kp["b_out"])

    if F_pad != F:
        out = out[:, :, :F]
    return out                                       # PyTorch Conv1d NCT layout, no XLA transpose


# ------------------------------------ pure-JAX reference --------------------------------
def reference_forward(x, params, window):
    B, _, T = x.shape
    xb = x[:, 0, :]
    pad = (WIN - HOP) // 2
    xp = jnp.pad(xb, ((0, 0), (pad, pad)))
    F = (T + 2 * pad - N_FFT) // HOP + 1
    idx = HOP * jnp.arange(F)[:, None] + jnp.arange(N_FFT)[None, :]
    frames = xp[:, idx]                                         # (B, F, N_FFT)
    spec = jnp.fft.rfft(frames * window[None, None, :], axis=-1)
    feats = jnp.concatenate([spec.real, spec.imag], axis=-1)    # (B, F, FEAT)

    def rms(v, g):
        return v * jax.lax.rsqrt(jnp.mean(v * v, -1, keepdims=True) + EPS) * g

    y = feats @ params["w_in"].T + params["b_in"]
    y = rms(y, params["g_in"])
    y = rms(y, params["g_fin"])
    y = y @ params["w_out"].T + params["b_out"]
    return y.transpose(0, 2, 1)                                 # (B, OUT_CHANNELS, F)


# ------------------------------------------- main ---------------------------------------
if __name__ == "__main__":
    key = jax.random.PRNGKey(0)
    kx, kp_key = jax.random.split(key)
    kx1, kx2 = jax.random.split(kx)

    params = make_params(kp_key)
    basis, window = make_dft_basis()
    kparams = prepare_kernel_params(params, basis)   # folded / bf16 weights (done once)

    fwd = jax.jit(lambda xx: conformer_encoder_stft_forward(xx, kparams))

    # main case: B=2, T=8192 -> 128 frames/batch (lane-dense tiles, 2 parallel grid programs)
    B, T = 2, 8192
    x = jax.random.normal(kx1, (B, 1, T), jnp.float32)
    out = jax.block_until_ready(fwd(x))
    F = (T + 2 * ((WIN - HOP) // 2) - N_FFT) // HOP + 1
    assert out.shape == (B, OUT_CHANNELS, F) and out.dtype == jnp.bfloat16
    ref = reference_forward(x, params, window)
    np.testing.assert_allclose(np.asarray(out).astype(np.float32), np.asarray(ref),
                               rtol=2e-2, atol=2e-2)

    # ragged case: F (=8) not a multiple of the 128-frame tile -> exercises zero-padded
    # frames inside the kernel and the output slice.
    B2, T2 = 1, 512
    x2 = jax.random.normal(kx2, (B2, 1, T2), jnp.float32)
    out2 = jax.block_until_ready(fwd(x2))
    F2 = (T2 + 2 * ((WIN - HOP) // 2) - N_FFT) // HOP + 1
    assert out2.shape == (B2, OUT_CHANNELS, F2)
    ref2 = reference_forward(x2, params, window)
    np.testing.assert_allclose(np.asarray(out2).astype(np.float32), np.asarray(ref2),
                               rtol=2e-2, atol=2e-2)

    print("KERNEL_OK")
</pallas_src>

<mosaic_0001>
module attributes {stable_mosaic.version = 11 : i64} {
  func.func @_fused_encoder_kernel(%arg0: i32, %arg1: i32, %arg2: memref<1x136x64xbf16, #tpu.memory_space<vmem>>, %arg3: memref<256x128xbf16, #tpu.memory_space<vmem>>, %arg4: memref<1x128xf32, #tpu.memory_space<vmem>>, %arg5: memref<1x128xf32, #tpu.memory_space<vmem>>, %arg6: memref<256x128xbf16, #tpu.memory_space<vmem>>, %arg7: memref<256x1xf32, #tpu.memory_space<vmem>>, %arg8: memref<1x256x128xbf16, #tpu.memory_space<vmem>>) attributes {dimension_semantics = [#tpu.dimension_semantics<parallel>, #tpu.dimension_semantics<parallel>], iteration_bounds = array<i64: 2, 1>, scalar_prefetch = 0 : i64, scratch_operands = 0 : i64, tpu.core_type = #tpu.core_type<tc>, window_params = [{transform_indices = @transform_0, window_bounds = array<i64: 1, 136, 64>}, {pipeline_mode = #tpu.pipeline_mode<synchronous>, transform_indices = @transform_1, window_bounds = array<i64: 256, 128>}, {pipeline_mode = #tpu.pipeline_mode<synchronous>, transform_indices = @transform_2, window_bounds = array<i64: 1, 128>}, {pipeline_mode = #tpu.pipeline_mode<synchronous>, transform_indices = @transform_3, window_bounds = array<i64: 1, 128>}, {pipeline_mode = #tpu.pipeline_mode<synchronous>, transform_indices = @transform_4, window_bounds = array<i64: 256, 128>}, {pipeline_mode = #tpu.pipeline_mode<synchronous>, transform_indices = @transform_5, window_bounds = array<i64: 256, 1>}, {transform_indices = @transform_6, window_bounds = array<i64: 1, 256, 128>}]} {
    %c128_i32 = arith.constant 128 : i32
    %0 = arith.muli %arg1, %c128_i32 : i32
    %1 = tpu.assume_multiple %0, 128 : i32
    %c0 = arith.constant 0 : index
    %2 = arith.index_cast %1 : i32 to index
    %c0_0 = arith.constant 0 : index
    %3 = vector.load %arg2[%c0, %2, %c0_0] : memref<1x136x64xbf16, #tpu.memory_space<vmem>>, vector<1x136x64xbf16>
    %4 = vector.shape_cast %3 : vector<1x136x64xbf16> to vector<136x64xbf16>
    %5 = vector.extract_strided_slice %4 {offsets = [0, 0], sizes = [128, 64], strides = [1, 1]} : vector<136x64xbf16> to vector<128x64xbf16>
    %6 = vector.extract_strided_slice %4 {offsets = [1, 0], sizes = [128, 64], strides = [1, 1]} : vector<136x64xbf16> to vector<128x64xbf16>
    %7 = vector.extract_strided_slice %4 {offsets = [2, 0], sizes = [128, 64], strides = [1, 1]} : vector<136x64xbf16> to vector<128x64xbf16>
    %8 = vector.extract_strided_slice %4 {offsets = [3, 0], sizes = [128, 64], strides = [1, 1]} : vector<136x64xbf16> to vector<128x64xbf16>
    %9 = tpu.concatenate %5, %6, %7, %8 in 1 : vector<128x64xbf16>, vector<128x64xbf16>, vector<128x64xbf16>, vector<128x64xbf16> -> vector<128x256xbf16>
    %c0_1 = arith.constant 0 : index
    %c0_2 = arith.constant 0 : index
    %10 = vector.load %arg3[%c0_1, %c0_2] : memref<256x128xbf16, #tpu.memory_space<vmem>>, vector<256x128xbf16>
    %cst = arith.constant dense<0.000000e+00> : vector<128x128xf32>
    %11 = tpu.matmul %9, %10, %cst {dimension_numbers = #tpu.dot_dimension_numbers<[1], [0], [0], [1], [0, 0, 1, 1], [], []>} : vector<128x256xbf16>, vector<256x128xbf16>, vector<128x128xf32> -> vector<128x128xf32>
    %c0_3 = arith.constant 0 : index
    %c0_4 = arith.constant 0 : index
    %12 = vector.load %arg4[%c0_3, %c0_4] : memref<1x128xf32, #tpu.memory_space<vmem>>, vector<1x128xf32>
    %13 = vector.broadcast %12 : vector<1x128xf32> to vector<128x128xf32>
    %14 = arith.addf %11, %13 : vector<128x128xf32>
    %15 = arith.mulf %14, %14 : vector<128x128xf32>
    %cst_5 = arith.constant dense<0.000000e+00> : vector<128xf32>
    %16 = vector.multi_reduction <add>, %15, %cst_5 [1] : vector<128x128xf32> to vector<128xf32>
    %17 = vector.shape_cast %16 : vector<128xf32> to vector<128x1xf32>
    %cst_6 = arith.constant 1.280000e+02 : f32
    %18 = vector.broadcast %cst_6 : f32 to vector<128x1xf32>
    %19 = arith.divf %17, %18 : vector<128x1xf32>
    %cst_7 = arith.constant 9.99999997E-7 : f32
    %20 = vector.broadcast %cst_7 : f32 to vector<128x1xf32>
    %21 = arith.addf %19, %20 : vector<128x1xf32>
    %22 = math.rsqrt %21 : vector<128x1xf32>
    %23 = vector.broadcast %22 : vector<128x1xf32> to vector<128x128xf32>
    %24 = arith.mulf %14, %23 : vector<128x128xf32>
    %c0_8 = arith.constant 0 : index
    %c0_9 = arith.constant 0 : index
    %25 = vector.load %arg5[%c0_8, %c0_9] : memref<1x128xf32, #tpu.memory_space<vmem>>, vector<1x128xf32>
    %26 = vector.broadcast %25 : vector<1x128xf32> to vector<128x128xf32>
    %27 = arith.mulf %24, %26 : vector<128x128xf32>
    %28 = arith.mulf %27, %27 : vector<128x128xf32>
    %cst_10 = arith.constant dense<0.000000e+00> : vector<128xf32>
    %29 = vector.multi_reduction <add>, %28, %cst_10 [1] : vector<128x128xf32> to vector<128xf32>
    %30 = vector.shape_cast %29 : vector<128xf32> to vector<128x1xf32>
    %cst_11 = arith.constant 1.280000e+02 : f32
    %31 = vector.broadcast %cst_11 : f32 to vector<128x1xf32>
    %32 = arith.divf %30, %31 : vector<128x1xf32>
    %cst_12 = arith.constant 9.99999997E-7 : f32
    %33 = vector.broadcast %cst_12 : f32 to vector<128x1xf32>
    %34 = arith.addf %32, %33 : vector<128x1xf32>
    %35 = math.rsqrt %34 : vector<128x1xf32>
    %36 = vector.broadcast %35 : vector<128x1xf32> to vector<128x128xf32>
    %37 = arith.mulf %27, %36 : vector<128x128xf32>
    %38 = tpu.transpose %37, [1, 0] : vector<128x128xf32> -> vector<128x128xf32>
    %39 = arith.truncf %38 : vector<128x128xf32> to vector<128x128xbf16>
    %c0_13 = arith.constant 0 : index
    %c0_14 = arith.constant 0 : index
    %40 = vector.load %arg6[%c0_13, %c0_14] : memref<256x128xbf16, #tpu.memory_space<vmem>>, vector<256x128xbf16>
    %cst_15 = arith.constant dense<0.000000e+00> : vector<256x128xf32>
    %41 = tpu.matmul %40, %39, %cst_15 {dimension_numbers = #tpu.dot_dimension_numbers<[1], [0], [0], [1], [0, 0, 1, 1], [], []>} : vector<256x128xbf16>, vector<128x128xbf16>, vector<256x128xf32> -> vector<256x128xf32>
    %c0_16 = arith.constant 0 : index
    %c0_17 = arith.constant 0 : index
    %42 = vector.load %arg7[%c0_16, %c0_17] : memref<256x1xf32, #tpu.memory_space<vmem>>, vector<256x1xf32>
    %43 = vector.broadcast %42 : vector<256x1xf32> to vector<256x128xf32>
    %44 = arith.addf %41, %43 : vector<256x128xf32>
    %45 = arith.truncf %44 : vector<256x128xf32> to vector<256x128xbf16>
    %c0_18 = arith.constant 0 : index
    %c0_19 = arith.constant 0 : index
    %c0_20 = arith.constant 0 : index
    %46 = vector.load %arg8[%c0_18, %c0_19, %c0_20] : memref<1x256x128xbf16, #tpu.memory_space<vmem>>, vector<1x256x128xbf16>
    %47 = vector.shape_cast %46 : vector<1x256x128xbf16> to vector<256x128xbf16>
    %48 = vector.shape_cast %45 : vector<256x128xbf16> to vector<1x256x128xbf16>
    tpu.vector_store %arg8[%c0_18, %c0_19, %c0_20], %48 {strides = array<i32>} : memref<1x256x128xbf16, #tpu.memory_space<vmem>>, vector<1x256x128xbf16>,
    return
  }
  func.func @transform_0(%arg0: i32, %arg1: i32) -> (i32, i32, i32) {
    %c0_i32 = arith.constant 0 : i32
    %c0_i32_0 = arith.constant 0 : i32
    %c0_i32_1 = arith.constant 0 : i32
    return %arg0, %c0_i32, %c0_i32_0 : i32, i32, i32
  }
  func.func @transform_1(%arg0: i32, %arg1: i32) -> (i32, i32) {
    %c0_i32 = arith.constant 0 : i32
    %c0_i32_0 = arith.constant 0 : i32
    %c0_i32_1 = arith.constant 0 : i32
    return %c0_i32, %c0_i32_0 : i32, i32
  }
  func.func @transform_2(%arg0: i32, %arg1: i32) -> (i32, i32) {
    %c0_i32 = arith.constant 0 : i32
    %c0_i32_0 = arith.constant 0 : i32
    %c0_i32_1 = arith.constant 0 : i32
    return %c0_i32, %c0_i32_0 : i32, i32
  }
  func.func @transform_3(%arg0: i32, %arg1: i32) -> (i32, i32) {
    %c0_i32 = arith.constant 0 : i32
    %c0_i32_0 = arith.constant 0 : i32
    %c0_i32_1 = arith.constant 0 : i32
    return %c0_i32, %c0_i32_0 : i32, i32
  }
  func.func @transform_4(%arg0: i32, %arg1: i32) -> (i32, i32) {
    %c0_i32 = arith.constant 0 : i32
    %c0_i32_0 = arith.constant 0 : i32
    %c0_i32_1 = arith.constant 0 : i32
    return %c0_i32, %c0_i32_0 : i32, i32
  }
  func.func @transform_5(%arg0: i32, %arg1: i32) -> (i32, i32) {
    %c0_i32 = arith.constant 0 : i32
    %c0_i32_0 = arith.constant 0 : i32
    %c0_i32_1 = arith.constant 0 : i32
    return %c0_i32, %c0_i32_0 : i32, i32
  }
  func.func @transform_6(%arg0: i32, %arg1: i32) -> (i32, i32, i32) {
    %c0_i32 = arith.constant 0 : i32
    %c0_i32_0 = arith.constant 0 : i32
    return %arg0, %c0_i32, %arg1 : i32, i32, i32
  }
}

</mosaic_0001>

<bundles_post_ra>
// kernel: _lambda_.1
= control target key start
LH: loop header
LB: loop body
LE: loop exit
PB: predicated region body
PF: predicated region fallthrough
CT: control target
= control target key end

     0   :  { %11 = vsyncpa [#allocation3], 0  ;;  %s3193_s0 = inlined_call_operand.vmem [shape: bf16[2,136,64], index: 0, kind: input, shape index: {}]   ;;  %s3194_s1 = inlined_call_operand.vmem [shape: bf16[256,128], index: 1, kind: input, shape index: {}]   ;;  %s3195_s2 = inlined_call_operand.vmem [shape: f32[1,128], index: 2, kind: input, shape index: {}]   ;;  %s3196_s3 = inlined_call_operand.vmem [shape: f32[1,128], index: 3, kind: input, shape index: {}]   ;;  %s3197_s4 = inlined_call_operand.vmem [shape: bf16[256,128], index: 4, kind: input, shape index: {}]   ;;  %s3198_s5 = inlined_call_operand.vmem [shape: f32[256,1], index: 5, kind: input, shape index: {}]   ;;  %s3199_s6 = inlined_call_operand.hbm [shape: bf16[2,256,128], index: 6, kind: output, shape index: {}]  }
   0x1   :  { %13 = vsyncpa [#allocation3 + $0x1], 0  ;;  %s2481_s21 = smov 0   ;;  %s2483_s22 = smov 0  }
   0x2   :  { %s2485_s23 = smov 0   ;;  %s2487_s24 = smov 0  }
   0x3   :  { %s2489_s25 = smov 0   ;;  %s2491_s26 = smov 0  }
   0x4 LB: > { %s1916_s27 = sadd.s32 4294967295, %s2440_s26   ;;  %s1917_s28 = sadd.s32 4294967294, %s2440_s26   ;;  %s2440_s26 = sphi %s2491_s26, %s19_s26   ;;  %s2436_s25 = sphi %s2489_s25, %s3206_s25   ;;  %s2432_s24 = sphi %s2487_s24, %s3205_s24   ;;  %s2428_s23 = sphi %s2485_s23, %s3204_s23   ;;  %s2424_s22 = sphi %s2483_s22, %s3203_s22   ;;  %s2420_s21 = sphi %s2481_s21, %s3202_s21  }
   0x5   : > { %s31_s29 = sadd.s32 1, %s2436_s25  ;;  %s171_s30 = sadd.s32 1, %s2428_s23 }
   0x6   : > { %p33_p0 = scmp.ge.s32.totalorder %s31_s29, 2  ;;  %p181_p1 = scmp.ne.s32.totalorder %s2428_s23, %s2424_s22 }
   0x7   : > { %p182_p2 = scmp.eq.s32.totalorder %s1916_s27, 1  ;;  %p187_p3 = scmp.ne.s32.totalorder %s2424_s22, %s2420_s21 }
   0x8   : > { %s3208_s29 = smov (%p33_p0, %s31_s29), 0  ;;  %p188_p5 = scmp.eq.s32.totalorder %s1917_s28, 1 }
   0x9   : > { %p2521_p4 = por %p182_p2, %p181_p1  ;;  %s166_s8 = ssub.s32 %s2436_s25, %s3208_s29 }
   0xa   : > { %p1920_p6 = scmp.ge.s32.totalorder %s2440_s26, 1  ;;  %p169_p7 = scmp.eq.s32.totalorder %s166_s8, 0 }
   0xb   : > { %p2528_p8 = por %p188_p5, %p187_p3  ;;  %p229_p9 = scmp.lt.s32.totalorder %s2440_s26, 3 }
   0xc   : > { %s2534_s10 = scalar_select %p169_p7, %s2428_s23, %s171_s30  }
   0xd   : > { %p230_p10 = pnand %p1920_p6, %p229_p9 }
   0xe   : > { %p259_p11 = scmp.lt.s32.totalorder (!%p230_p10), %s2432_s24, 1  ;;  %s2442_s8 = smov (!%p230_p10), 64  }
   0xf   : > { %233 = sbr.rel (%p230_p10) target bundleno = 1144 (0x478), region = 44  ;;  %s256_s20 = sand.u32 (!%p230_p10), 1, %s2424_s22  }
  0x10   : > { %s1921_s27 = sshll.u32 (!%p230_p10), %s256_s20, 7  ;;  %s2128_s30 = sshll.u32 (!%p230_p10), %s2432_s24, 7 }
  0x11   : > { %s3124_s28 = scalar_lea.vmem (!%p230_p10), [#allocation2], %s1921_s27  ;;  %s1826_s14 = scalar_lea.sflag (!%p230_p10), [#allocation3], %s256_s20 }
  0x12   : > { %s1839_s13 = sshll.u32 (!%p230_p10), %s3124_s28, 4  ;;  %s2382_s27 = scalar_lea.hbm (!%p230_p10), %s3199_s6, 256  ;;  %s1840_s13 = int_to_ptr.vmem [resolvable:$true] %s1839_s13 }
  0x14   : > { %s260_s11 = scalar_select %p259_p11, %s2432_s24, 1  ;;  %v2103_v8 = vld [vmem:[%s3194_s1 + $0x38] sm:$0xff]  ;;  %vm329_vm0 = vsmask.f32 7424  ;;  %v2102_v15 = vld [vmem:[%s3194_s1 + $0x30] sm:$0xff]  ;;  %v2101_v31 = vld [vmem:[%s3194_s1 + $0x28] sm:$0xff] }
  0x15   : > { %675 = vmatpush.bf16.msra.mxu0 %v2103_v8  ;;  %v2111_v16 = vld [vmem:[%s3194_s1 + $0x78] sm:$0xff]  ;;  %v2110_v35 = vld [vmem:[%s3194_s1 + $0x70] sm:$0xff]  ;;  %vm432_vm1 = vsmask.f32 6400  ;;  %v2109_v40 = vld [vmem:[%s3194_s1 + $0x68] sm:$0xff]  ;;  %vm486_vm2 = vcmask 523264  }
  0x16   : > { %s2232_s12 = smul.u32 68, %s260_s11  ;;  %724 = vmatpush.bf16.msra.mxu1 %v2111_v16  ;;  %v2100_v42 = vld [vmem:[%s3194_s1 + $0x20] sm:$0xff]  ;;  %v2099_v51 = vld [vmem:[%s3194_s1 + $0x18] sm:$0xff]  ;;  %v2098_v60 = vld [vmem:[%s3194_s1 + $0x10] sm:$0xff]  ;;  %vm414_vm3 = vcmask 1046528  }
  0x17   : > { %v2108_v50 = vld [vmem:[%s3194_s1 + $0x60] sm:$0xff]  ;;  %v2107_v59 = vld [vmem:[%s3194_s1 + $0x58] sm:$0xff] }
  0x18   : > { %s2541_s15 = scalar_lea.vmem %s3193_s0, %s2232_s12  ;;  %s1838_s12 = scalar_lea.hbm %s3199_s6, %s2128_s30 }
  0x19   : > { %v2544_v0 = vld [vmem:[%s2541_s15] sm:$0xff]  ;;  %v2547_v1 = vld [vmem:[%s2541_s15 + $0x8] sm:$0xff]  ;;  %v2550_v2 = vld [vmem:[%s2541_s15 + $0x10] sm:$0xff]  ;;  %676 = vmatpush.bf16.msra.mxu0 %v2102_v15  ;;  %s1841_s24 = sshll.u32 %s1838_s12, 4  ;;  %s1842_s24 = int_to_ptr.hbm [resolvable:$true] %s1841_s24 }
  0x1a   : > { %v2553_v3 = vld [vmem:[%s2541_s15 + $0x18] sm:$0xff]  ;;  %v331_v4 = vshrl.u32 %v2544_v0, 16  ;;  %v333_v5 = vshll.u32 %v2544_v0, 16  ;;  %v338_v6 = vshll.u32 %v2547_v1, 16  ;;  %v342_v7 = vshrl.u32 %v2547_v1, 16  ;;  %v2574_v29 = vld [vmem:[%s2541_s15 + $0x20] sm:$0xff]  ;;  %725 = vmatpush.bf16.msra.mxu1 %v2110_v35 }
  0x1b   : > { %v346_v9 = vshll.u32 %v2550_v2, 16  ;;  %v350_v10 = vshrl.u32 %v2550_v2, 16  ;;  %v354_v11 = vshll.u32 %v2553_v3, 16  ;;  %v358_v30 = vshrl.u32 %v2553_v3, 16  ;;  %v2598_v48 = vld [vmem:[%s2541_s15 + $0x28] sm:$0xff]  ;;  %v2613_v57 = vld [vmem:[%s2541_s15 + $0x30] sm:$0xff] }
  0x1c   : > { %v335_v12 = vrot.slane %v333_v5, 1  ;;  %v340_v13 = vrot.slane %v338_v6, 1  ;;  %v433_v14 = vrot.slane %v331_v4, 1  ;;  %v434_v17 = vrot.slane %v333_v5, 2  ;;  %s2376_s16 = sshra.s32 %s1842_s24, 4  ;;  %s2377_s16 = int_to_ptr.hbm [resolvable:$true] %s2376_s16 }
  0x1d   : > { %v436_v18 = vrot.slane %v342_v7, 1  ;;  %v437_v19 = vrot.slane %v338_v6, 2  ;;  %v348_v20 = vrot.slane %v346_v9, 1  ;;  %v440_v23 = vrot.slane %v350_v10, 1  ;;  %677 = vmatpush.bf16.msra.mxu0 %v2101_v31  ;;  %s2378_s17 = scalar_lea.hbm %s2377_s16, 128  ;;  %p2383_p1 = scmp.lt.s32.totalorder %s2377_s16, %s3199_s6 }
  0x1e   : > { %v336_v21 = vor.u32 %v335_v12, %v331_v4  ;;  %v344_v22 = vor.u32 %v342_v7, %v340_v13  ;;  %v441_v24 = vrot.slane %v346_v9, 2  ;;  %v356_v25 = vrot.slane %v354_v11, 1  ;;  %726 = vmatpush.bf16.msra.mxu1 %v2109_v40  ;;  %v2106_v9 = vld [vmem:[%s3194_s1 + $0x50] sm:$0xff]  ;;  %p2379_p12 = scmp.ne.s32.totalorder %s2377_s16, %s2378_s17  ;;  %p2384_p2 = scmp.lt.s32.totalorder %s2382_s27, %s2378_s17 }
  0x1f   : > { %v352_v26 = vor.u32 %v350_v10, %v348_v20  ;;  %v435_v32 = vor.u32 %v434_v17, %v433_v14  ;;  %v438_v33 = vor.u32 %v437_v19, %v436_v18  ;;  %v366_v37 = vshrl.u32 %v2574_v29, 16  ;;  %v2630_v10 = vld [vmem:[%s2541_s15 + $0x38] sm:$0xff]  ;;  %v2096_v19 = vld [vmem:[%s3194_s1] sm:$0xff] }
  0x20   : > { %v341_v27 = vsel %vm329_vm0, %v336_v21, %v340_v13  ;;  %v349_v28 = vsel %vm329_vm0, %v344_v22, %v348_v20  ;;  %v442_v36 = vor.u32 %v441_v24, %v440_v23  ;;  %v444_v38 = vrot.slane %v358_v30, 1  ;;  %p2380_p13 = pnand %p2379_p12, %p2521_p4  ;;  %p2385_p3 = por %p2384_p2, %p2383_p1 }
  0x21   : > { %398 = vrot.lane.b32.xlu0 %v341_v27, %s2442_s8  ;;  %400 = vrot.lane.b32.xlu1 %v349_v28, %s2442_s8  ;;  %v357_v34 = vsel %vm329_vm0, %v352_v26, %v356_v25  ;;  %v445_v39 = vrot.slane %v354_v11, 2  ;;  %v362_v41 = vshll.u32 %v2574_v29, 16  ;;  %v439_v44 = vsel %vm432_vm1, %v435_v32, %v438_v33  ;;  %v2097_v11 = vld [vmem:[%s3194_s1 + $0x8] sm:$0xff]  ;;  %v285_v32 = vld [vmem:[%s2541_s15 + $0x40] sm:$0xf] }
  0x22   : > { %402 = vrot.lane.b32.xlu2 %v357_v34, %s2442_s8  ;;  %v443_v45 = vsel %vm432_vm1, %v438_v33, %v442_v36  ;;  %v448_v46 = vrot.slane %v366_v37, 1  ;;  %678 = vmatpush.bf16.msra.mxu0 %v2100_v42  ;;  %v360_v52 = vor.u32 %v358_v30, %v356_v25  ;;  %v370_v55 = vshll.u32 %v2598_v48, 16  ;;  %p2381_p0 = pneg %p2380_p13 }
  0x23   : > { %v446_v43 = vor.u32 %v445_v39, %v444_v38  ;;  %v449_v47 = vrot.slane %v362_v41, 2  ;;  %v364_v53 = vrot.slane %v362_v41, 1  ;;  %v374_v56 = vshrl.u32 %v2598_v48, 16  ;;  %727 = vmatpush.bf16.msra.mxu1 %v2108_v50  ;;  %v2104_v41 = vld [vmem:[%s3194_s1 + $0x40] sm:$0xff] }
  0x24   : > { %v372_v62 = vrot.slane %v370_v55, 1  ;;  %v453_v5 = vrot.slane %v370_v55, 2  ;;  %v378_v6 = vshll.u32 %v2613_v57, 16  ;;  %v382_v8 = vshrl.u32 %v2613_v57, 16  ;;  %p2386_p5 = pnand %p2385_p3, %p2381_p0 }
  0x25   : > { %v447_v49 = vsel %vm432_vm1, %v442_v36, %v446_v43  ;;  %v450_v54 = vor.u32 %v449_v47, %v448_v46  ;;  %v368_v58 = vor.u32 %v366_v37, %v364_v53  ;;  %v365_v61 = vsel %vm329_vm0, %v360_v52, %v364_v53  ;;  %v2105_v37 = vld [vmem:[%s3194_s1 + $0x48] sm:$0xff] }
  0x26   : > { %679 = vmatpush.bf16.msra.mxu0 %v2099_v51  ;;  %v452_v4 = vrot.slane %v374_v56, 1  ;;  %v456_v12 = vrot.slane %v382_v8, 1  ;;  %v457_v13 = vrot.slane %v378_v6, 2  ;;  %v376_v15 = vor.u32 %v374_v56, %v372_v62 }
  0x27   : > { %v451_v63 = vsel %vm432_vm1, %v446_v43, %v450_v54  ;;  %v373_v7 = vsel %vm329_vm0, %v368_v58, %v372_v62  ;;  %728 = vmatpush.bf16.msra.mxu1 %v2107_v59  ;;  %v380_v16 = vrot.slane %v378_v6, 1  ;;  %v390_v17 = vshrl.u32 %v2630_v10, 16 }
  0x28   : > { %v454_v14 = vor.u32 %v453_v5, %v452_v4  ;;  %v386_v18 = vshll.u32 %v2630_v10, 16  ;;  %v458_v20 = vor.u32 %v457_v13, %v456_v12  ;;  %v327_v33 = vunpack.c.l.b16 %v285_v32 }
  0x29   : > { %470 = vrot.lane.b32.xlu0 %v439_v44, %s2442_s8  ;;  %472 = vrot.lane.b32.xlu1 %v443_v45, %s2442_s8  ;;  %v381_v22 = vsel %vm329_vm0, %v376_v15, %v380_v16  ;;  %v460_v23 = vrot.slane %v390_v17, 1  ;;  %v384_v26 = vor.u32 %v382_v8, %v380_v16  ;;  %v416_v50 = vrot.slane %v2547_v1, 1 }
  0x2a   : > { %474 = vrot.lane.b32.xlu2 %v447_v49, %s2442_s8  ;;  %680 = vmatpush.bf16.msra.mxu0 %v2098_v60  ;;  %v455_v21 = vsel %vm432_vm1, %v450_v54, %v454_v14  ;;  %v461_v24 = vrot.slane %v386_v18, 2  ;;  %v459_v25 = vsel %vm432_vm1, %v454_v14, %v458_v20  ;;  %v388_v27 = vrot.slane %v386_v18, 1 }
  0x2b   : > { %729 = vmatpush.bf16.msra.mxu1 %v2106_v9  ;;  %v2654_v34 = vpack.c.b16 %v327_v33, %v327_v33  ;;  %v415_v49 = vrot.slane %v2544_v0, 1  ;;  %v418_v56 = vrot.slane %v2550_v2, 1  ;;  %v420_v62 = vrot.slane %v2553_v3, 1  ;;  %v2712_v33 = vld [vmem:[%s3195_s2] ss:$0 sm:$0xff] }
  0x2c   : > { %v462_v28 = vor.u32 %v461_v24, %v460_v23  ;;  %v389_v30 = vsel %vm329_vm0, %v384_v26, %v388_v27  ;;  %v392_v43 = vor.u32 %v390_v17, %v388_v27  ;;  %v424_v13 = vrot.slane %v2598_v48, 1 }
  0x2d   : > { %v394_v35 = vshll.u32 %v2654_v34, 16  ;;  %v464_v36 = vshrl.u32 %v2654_v34, 16  ;;  %v417_v51 = vsel %vm414_vm3, %v415_v49, %v416_v50  ;;  %v419_v59 = vsel %vm414_vm3, %v416_v50, %v418_v56 }
  0x2e   : > { %681 = vmatpush.bf16.msra.mxu0 %v2097_v11  ;;  %v463_v31 = vsel %vm432_vm1, %v458_v20, %v462_v28  ;;  %v421_v4 = vsel %vm414_vm3, %v418_v56, %v420_v62  ;;  %v426_v18 = vrot.slane %v2613_v57, 1  ;;  %v428_v23 = vrot.slane %v2630_v10, 1 }
  0x2f   : > { %v466_v38 = vrot.slane %v464_v36, 1  ;;  %v467_v39 = vrot.slane %v394_v35, 2  ;;  %730 = vmatpush.bf16.msra.mxu1 %v2105_v37  ;;  %v396_v44 = vrot.slane %v394_v35, 1 }
  0x30   : > { %v427_v20 = vsel %vm414_vm3, %v424_v13, %v426_v18 }
  0x31   : > { %404 = vrot.lane.b32.xlu0 %v365_v61, %s2442_s8  ;;  %476 = vrot.lane.b32.xlu1 %v451_v63, %s2442_s8  ;;  %v468_v40 = vor.u32 %v467_v39, %v466_v38  ;;  %v397_v45 = vsel %vm329_vm0, %v392_v43, %v396_v44 }
  0x32   : > { %406 = vrot.lane.b32.xlu2 %v373_v7, %s2442_s8  ;;  %682 = vmatpush.bf16.msra.mxu0 %v2096_v19  ;;  %v422_v7 = vrot.slane %v2574_v29, 1 }
  0x33   : > { %v469_v42 = vsel %vm432_vm1, %v462_v28, %v468_v40  ;;  %731 = vmatpush.bf16.msra.mxu1 %v2104_v41  ;;  %v430_v28 = vrot.slane %v2654_v34, 1 }
  0x34   : > { %v423_v9 = vsel %vm414_vm3, %v420_v62, %v422_v7  ;;  %v425_v15 = vsel %vm414_vm3, %v422_v7, %v424_v13 }
  0x39   : > { %478 = vrot.lane.b32.xlu0 %v455_v21, %s2442_s8  ;;  %408 = vrot.lane.b32.xlu1 %v381_v22, %s2442_s8 }
  0x3a   : > { %480 = vrot.lane.b32.xlu2 %v459_v25, %s2442_s8  ;;  %v429_v25 = vsel %vm414_vm3, %v426_v18, %v428_v23 }
  0x41   : > { %410 = vrot.lane.b32.xlu0 %v389_v30, %s2442_s8  ;;  %482 = vrot.lane.b32.xlu1 %v463_v31, %s2442_s8  ;;  %v431_v31 = vsel %vm414_vm3, %v428_v23, %v430_v28 }
  0x42   : > { %412 = vrot.lane.b32.xlu2 %v397_v45, %s2442_s8 }
  0x49   : > { %484 = vrot.lane.b32.xlu0 %v469_v42, %s2442_s8 }
  0x7c   : > { %v403_v60 = vpop.permute.xlu2 %402 }
  0x7d   : > { %v494_v61 = vsel %vm486_vm2, %v2550_v2, %v403_v60 }
  0x84   : > { %v475_v63 = vpop.permute.xlu2 %474 }
  0x8c   : > { %v407_v11 = vpop.permute.xlu2 %406 }
  0x8d   : > { %v500_v12 = vsel %vm486_vm2, %v2574_v29, %v407_v11 }
  0x93   : > { %v399_v46 = vpop.permute.xlu0 %398  ;;  %v401_v54 = vpop.permute.xlu1 %400 }
  0x94   : > { %v488_v47 = vsel %vm486_vm2, %v2544_v0, %v399_v46  ;;  %v491_v55 = vsel %vm486_vm2, %v2547_v1, %v401_v54  ;;  %v521_v1 = vsel %vm486_vm2, %v421_v4, %v475_v63  ;;  %v481_v19 = vpop.permute.xlu2 %480 }
  0x95   : > { %683 = vmatmul.bf16.vlgmr.msra.gmra.mxu0 %v488_v47  ;;  %v533_v29 = vsel %vm486_vm2, %v427_v20, %v481_v19 }
  0x9b   : > { %v471_v52 = vpop.permute.xlu0 %470  ;;  %v473_v58 = vpop.permute.xlu1 %472 }
  0x9c   : > { %v513_v53 = vsel %vm486_vm2, %v417_v51, %v471_v52  ;;  %v517_v0 = vsel %vm486_vm2, %v419_v59, %v473_v58  ;;  %v413_v26 = vpop.permute.xlu2 %412 }
  0x9d   : > { %732 = vmatmul.bf16.vlgmr.msra.gmra.mxu1 %v513_v53  ;;  %v509_v27 = vsel %vm486_vm2, %v2630_v10, %v413_v26 }
  0xa3   : > { %v405_v5 = vpop.permute.xlu0 %404  ;;  %v477_v8 = vpop.permute.xlu1 %476 }
  0xa4   : > { %v497_v6 = vsel %vm486_vm2, %v2553_v3, %v405_v5  ;;  %v525_v2 = vsel %vm486_vm2, %v423_v9, %v477_v8 }
  0xa5   : > { %688 = vmatmul.bf16.gmra.mxu0 %v491_v55 }
  0xab   : > { %v479_v14 = vpop.permute.xlu0 %478  ;;  %v409_v16 = vpop.permute.xlu1 %408 }
  0xac   : > { %v529_v3 = vsel %vm486_vm2, %v425_v15, %v479_v14  ;;  %v503_v17 = vsel %vm486_vm2, %v2598_v48, %v409_v16 }
  0xad   : > { %737 = vmatmul.bf16.gmra.mxu1 %v517_v0 }
  0xb3   : > { %v411_v21 = vpop.permute.xlu0 %410  ;;  %v483_v24 = vpop.permute.xlu1 %482 }
  0xb4   : > { %v506_v22 = vsel %vm486_vm2, %v2613_v57, %v411_v21  ;;  %v537_v48 = vsel %vm486_vm2, %v429_v25, %v483_v24 }
  0xb5   : > { %693 = vmatmul.bf16.gmra.mxu0 %v494_v61 }
  0xbb   : > { %v485_v30 = vpop.permute.xlu0 %484 }
  0xbc   : > { %v541_v57 = vsel %vm486_vm2, %v431_v31, %v485_v30 }
  0xbd   : > { %742 = vmatmul.bf16.gmra.mxu1 %v521_v1 }
  0xc5   : > { %698 = vmatmul.bf16.gmra.mxu0 %v497_v6 }
  0xcd   : > { %747 = vmatmul.bf16.gmra.mxu1 %v525_v2 }
  0xd5   : > { %703 = vmatmul.bf16.gmra.mxu0 %v500_v12 }
  0xdd   : > { %752 = vmatmul.bf16.gmra.mxu1 %v529_v3 }
  0xe5   : > { %708 = vmatmul.bf16.gmra.mxu0 %v503_v17 }
  0xed   : > { %757 = vmatmul.bf16.gmra.mxu1 %v533_v29 }
  0xf5   : > { %713 = vmatmul.bf16.gmra.mxu0 %v506_v22 }
  0xfd   : > { %762 = vmatmul.bf16.gmra.mxu1 %v537_v48 }
 0x105   : > { %718 = vmatmul.bf16.gmra.mxu0 %v509_v27 }
 0x10d   : > { %767 = vmatmul.bf16.gmra.mxu1 %v541_v57  ;;  %v2443_v57 = vmov 128.0  }
 0x10e   : > { %2296 = vrcp.f32 %v2443_v57 }
 0x112   : > { %v684_v32 = vpop.f32.mrf.mxu0 }
 0x113   : > { %v685_v35 = vadd.f32 %v2712_v33, %v684_v32 }
 0x11a   : > { %v686_v36 = vpop.f32.mrf.mxu0  ;;  %v733_v37 = vpop.f32.mrf.mxu1 }
 0x11b   : > { %v2715_v10 = vadd.f32 %v733_v37, %v685_v35  ;;  %v687_v38 = vadd.f32 %v2712_v33, %v686_v36  ;;  %v2297_v37 = vpop.eup %2296 }
 0x11c   : > { %vm826_vm4 = vweird.f32 %v2297_v37 }
 0x11d   : > { %v773_v34 = vmul.f32 %v2715_v10, %v2715_v10 }
 0x11f   : > { %789 = vadd.xlane.f32.xlu1 %v773_v34 }
 0x122   : > { %v689_v39 = vpop.f32.mrf.mxu0  ;;  %v735_v40 = vpop.f32.mrf.mxu1 }
 0x123   : > { %v2720_v41 = vadd.f32 %v735_v40, %v687_v38  ;;  %v690_v43 = vadd.f32 %v2712_v33, %v689_v39  ;;  %v822_v38 = vmul.f32 128.0, %v2297_v37 }
 0x125   : > { %v774_v42 = vmul.f32 %v2720_v41, %v2720_v41 }
 0x127   : > { %791 = vadd.xlane.f32.xlu2 %v774_v42 }
 0x12a   : > { %v691_v44 = vpop.f32.mrf.mxu0  ;;  %v738_v45 = vpop.f32.mrf.mxu1 }
 0x12b   : > { %v2725_v46 = vadd.f32 %v738_v45, %v690_v43  ;;  %v692_v49 = vadd.f32 %v2712_v33, %v691_v44  ;;  %v823_v44 = vsub.f32 1.0, %v822_v38 }
 0x12d   : > { %v775_v47 = vmul.f32 %v2725_v46, %v2725_v46 }
 0x12f   : > { %793 = vadd.xlane.f32.xlu0 %v775_v47 }
 0x132   : > { %v694_v50 = vpop.f32.mrf.mxu0  ;;  %v740_v51 = vpop.f32.mrf.mxu1 }
 0x133   : > { %v2730_v52 = vadd.f32 %v740_v51, %v692_v49  ;;  %v695_v54 = vadd.f32 %v2712_v33, %v694_v50  ;;  %v824_v49 = vmul.f32 %v2297_v37, %v823_v44 }
 0x135   : > { %v776_v53 = vmul.f32 %v2730_v52, %v2730_v52 }
 0x137   : > { %795 = vadd.xlane.f32.xlu2 %v776_v53  ;;  %v825_v53 = vadd.f32 %v2297_v37, %v824_v49 }
 0x13a   : > { %v696_v55 = vpop.f32.mrf.mxu0  ;;  %v743_v56 = vpop.f32.mrf.mxu1 }
 0x13b   : > { %v2735_v58 = vadd.f32 %v743_v56, %v695_v54  ;;  %v697_v0 = vadd.f32 %v2712_v33, %v696_v55  ;;  %v2789_v56 = vsel %vm826_vm4, %v2297_v37, %v825_v53 }
 0x13d   : > { %v777_v59 = vmul.f32 %v2735_v58, %v2735_v58 }
 0x13f   : > { %797 = vadd.xlane.f32.xlu1 %v777_v59 }
 0x142   : > { %v699_v60 = vpop.f32.mrf.mxu0  ;;  %v745_v61 = vpop.f32.mrf.mxu1 }
 0x143   : > { %v2740_v62 = vadd.f32 %v745_v61, %v697_v0  ;;  %v700_v4 = vadd.f32 %v2712_v33, %v699_v60 }
 0x145   : > { %v778_v63 = vmul.f32 %v2740_v62, %v2740_v62 }
 0x147   : > { %799 = vadd.xlane.f32.xlu2 %v778_v63 }
 0x14a   : > { %v701_v1 = vpop.f32.mrf.mxu0  ;;  %v748_v5 = vpop.f32.mrf.mxu1 }
 0x14b   : > { %v2745_v6 = vadd.f32 %v748_v5, %v700_v4  ;;  %v702_v8 = vadd.f32 %v2712_v33, %v701_v1 }
 0x14d   : > { %v779_v7 = vmul.f32 %v2745_v6, %v2745_v6 }
 0x14f   : > { %801 = vadd.xlane.f32.xlu0 %v779_v7 }
 0x152   : > { %v704_v9 = vpop.f32.mrf.mxu0  ;;  %v750_v2 = vpop.f32.mrf.mxu1 }
 0x153   : > { %v2750_v11 = vadd.f32 %v750_v2, %v702_v8  ;;  %v705_v13 = vadd.f32 %v2712_v33, %v704_v9 }
 0x155   : > { %v780_v12 = vmul.f32 %v2750_v11, %v2750_v11 }
 0x157   : > { %803 = vadd.xlane.f32.xlu1 %v780_v12 }
 0x15a   : > { %v706_v14 = vpop.f32.mrf.mxu0  ;;  %v753_v15 = vpop.f32.mrf.mxu1 }
 0x15b   : > { %v2755_v3 = vadd.f32 %v753_v15, %v705_v13  ;;  %v707_v17 = vadd.f32 %v2712_v33, %v706_v14 }
 0x15d   : > { %v781_v16 = vmul.f32 %v2755_v3, %v2755_v3 }
 0x15f   : > { %805 = vadd.xlane.f32.xlu2 %v781_v16 }
 0x162   : > { %v709_v18 = vpop.f32.mrf.mxu0  ;;  %v755_v19 = vpop.f32.mrf.mxu1 }
 0x163   : > { %v2760_v20 = vadd.f32 %v755_v19, %v707_v17  ;;  %v710_v21 = vadd.f32 %v2712_v33, %v709_v18 }
 0x165   : > { %v782_v29 = vmul.f32 %v2760_v20, %v2760_v20 }
 0x167   : > { %807 = vadd.xlane.f32.xlu0 %v782_v29  ;;  %v2802_v29 = vld [vmem:[%s3196_s3] ss:$0 sm:$0xff] }
 0x16a   : > { %v711_v22 = vpop.f32.mrf.mxu0  ;;  %v758_v23 = vpop.f32.mrf.mxu1 }
 0x16b   : > { %v2765_v24 = vadd.f32 %v758_v23, %v710_v21  ;;  %v712_v48 = vadd.f32 %v2712_v33, %v711_v22 }
 0x16d   : > { %v783_v25 = vmul.f32 %v2765_v24, %v2765_v24 }
 0x16f   : > { %809 = vadd.xlane.f32.xlu1 %v783_v25 }
 0x172   : > { %v714_v26 = vpop.f32.mrf.mxu0  ;;  %v760_v27 = vpop.f32.mrf.mxu1 }
 0x173   : > { %v2770_v28 = vadd.f32 %v760_v27, %v712_v48  ;;  %v715_v31 = vadd.f32 %v2712_v33, %v714_v26 }
 0x175   : > { %v784_v30 = vmul.f32 %v2770_v28, %v2770_v28 }
 0x177   : > { %811 = vadd.xlane.f32.xlu2 %v784_v30 }
 0x17a   : > { %v763_v32 = vpop.f32.mrf.mxu1  ;;  %v716_v36 = vpop.f32.mrf.mxu0 }
 0x17b   : > { %v2775_v35 = vadd.f32 %v763_v32, %v715_v31  ;;  %v717_v39 = vadd.f32 %v2712_v33, %v716_v36 }
 0x17d   : > { %v785_v34 = vmul.f32 %v2775_v35, %v2775_v35 }
 0x17f   : > { %813 = vadd.xlane.f32.xlu0 %v785_v34 }
 0x182   : > { %v765_v40 = vpop.f32.mrf.mxu1  ;;  %v719_v43 = vpop.f32.mrf.mxu0 }
 0x183   : > { %v2780_v42 = vadd.f32 %v765_v40, %v717_v39  ;;  %v720_v47 = vadd.f32 %v2712_v33, %v719_v43 }
 0x185   : > { %v786_v45 = vmul.f32 %v2780_v42, %v2780_v42 }
 0x187   : > { %815 = vadd.xlane.f32.xlu1 %v786_v45 }
 0x18a   : > { %v768_v50 = vpop.f32.mrf.mxu1  ;;  %v721_v55 = vpop.f32.mrf.mxu0 }
 0x18b   : > { %v2785_v51 = vadd.f32 %v768_v50, %v720_v47  ;;  %v722_v59 = vadd.f32 %v2712_v33, %v721_v55 }
 0x18d   : > { %v787_v54 = vmul.f32 %v2785_v51, %v2785_v51 }
 0x18f   : > { %817 = vadd.xlane.f32.xlu2 %v787_v54 }
 0x192   : > { %v790_v0 = vpop.xlane.xlu1 %789  ;;  %v770_v60 = vpop.f32.mrf.mxu1 }
 0x193   : > { %v828_v61 = vmul.f32 %v2789_v56, %v790_v0  ;;  %v2793_v63 = vadd.f32 %v770_v60, %v722_v59 }
 0x195   : > { %v844_v4 = vadd.f32 1e-06, %v828_v61  ;;  %v788_v1 = vmul.f32 %v2793_v63, %v2793_v63 }
 0x197   : > { %2298 = vrsqrt.f32 %v844_v4  ;;  %819 = vadd.xlane.f32.xlu0 %v788_v1  ;;  %vm866_vm6 = vweird.f32 %v844_v4 }
 0x19a   : > { %v792_v5 = vpop.xlane.xlu2 %791 }
 0x19b   : > { %v829_v7 = vmul.f32 %v2789_v56, %v792_v5 }
 0x19d   : > { %v2299_v8 = vpop.eup %2298  ;;  %v845_v9 = vadd.f32 1e-06, %v829_v7 }
 0x19e   : > { %v861_v2 = vmul.f32 %v2299_v8, %v844_v4  ;;  %vm867_vm5 = vweird.f32 %v2299_v8 }
 0x19f   : > { %2300 = vrsqrt.f32 %v845_v9  ;;  %vm868_vm7 = vmor %vm866_vm6, %vm867_vm5  ;;  %vm876_vm9 = vweird.f32 %v845_v9 }
 0x1a0   : > { %v862_v33 = vmul.f32 %v2299_v8, %v861_v2 }
 0x1a2   : > { %v863_v12 = vmul.f32 0.5, %v862_v33  ;;  %v794_v13 = vpop.xlane.xlu0 %793 }
 0x1a3   : > { %v830_v14 = vmul.f32 %v2789_v56, %v794_v13 }
 0x1a4   : > { %v864_v15 = vsub.f32 1.5, %v863_v12 }
 0x1a5   : > { %v2301_v16 = vpop.eup %2300  ;;  %v846_v17 = vadd.f32 1e-06, %v830_v14 }
 0x1a6   : > { %v865_v18 = vmul.f32 %v2299_v8, %v864_v15  ;;  %v871_v19 = vmul.f32 %v2301_v16, %v845_v9  ;;  %vm877_vm8 = vweird.f32 %v2301_v16 }
 0x1a7   : > { %2302 = vrsqrt.f32 %v846_v17  ;;  %vm878_vm10 = vmor %vm876_vm9, %vm877_vm8  ;;  %vm886_vm12 = vweird.f32 %v846_v17 }
 0x1a8   : > { %v872_v21 = vmul.f32 %v2301_v16, %v871_v19  ;;  %v869_v22 = vsel %vm868_vm7, %v2299_v8, %v865_v18 }
 0x1a9   : > { %v1020_v23 = vmul.f32 %v869_v22, %v2715_v10 }
 0x1aa   : > { %v873_v25 = vmul.f32 0.5, %v872_v21  ;;  %v796_v48 = vpop.xlane.xlu2 %795 }
 0x1ab   : > { %v831_v26 = vmul.f32 %v2789_v56, %v796_v48  ;;  %v2807_v27 = vmul.f32 %v2802_v29, %v1020_v23 }
 0x1ac   : > { %v874_v30 = vsub.f32 1.5, %v873_v25 }
 0x1ad   : > { %v2303_v31 = vpop.eup %2302  ;;  %v847_v57 = vadd.f32 1e-06, %v831_v26  ;;  %v1056_v32 = vmul.f32 %v2807_v27, %v2807_v27 }
 0x1ae   : > { %v875_v36 = vmul.f32 %v2301_v16, %v874_v30  ;;  %v881_v37 = vmul.f32 %v2303_v31, %v846_v17  ;;  %vm887_vm11 = vweird.f32 %v2303_v31 }
 0x1af   : > { %2304 = vrsqrt.f32 %v847_v57  ;;  %1072 = vadd.xlane.f32.xlu1 %v1056_v32  ;;  %vm888_vm13 = vmor %vm886_vm12, %vm887_vm11  ;;  %vm896_vm15 = vweird.f32 %v847_v57 }
 0x1b0   : > { %v882_v10 = vmul.f32 %v2303_v31, %v881_v37  ;;  %v879_v34 = vsel %vm878_vm10, %v2301_v16, %v875_v36 }
 0x1b1   : > { %v1021_v38 = vmul.f32 %v879_v34, %v2720_v41 }
 0x1b2   : > { %v883_v39 = vmul.f32 0.5, %v882_v10  ;;  %v798_v40 = vpop.xlane.xlu1 %797 }
 0x1b3   : > { %v832_v43 = vmul.f32 %v2789_v56, %v798_v40  ;;  %v2814_v44 = vmul.f32 %v2802_v29, %v1021_v38 }
 0x1b4   : > { %v884_v45 = vsub.f32 1.5, %v883_v39 }
 0x1b5   : > { %v2305_v47 = vpop.eup %2304  ;;  %v848_v49 = vadd.f32 1e-06, %v832_v43  ;;  %v1057_v50 = vmul.f32 %v2814_v44, %v2814_v44 }
 0x1b6   : > { %v885_v53 = vmul.f32 %v2303_v31, %v884_v45  ;;  %v891_v54 = vmul.f32 %v2305_v47, %v847_v57  ;;  %vm897_vm14 = vweird.f32 %v2305_v47 }
 0x1b7   : > { %2306 = vrsqrt.f32 %v848_v49  ;;  %1074 = vadd.xlane.f32.xlu2 %v1057_v50  ;;  %vm898_vm0 = vmor %vm896_vm15, %vm897_vm14  ;;  %vm906_vm2 = vweird.f32 %v848_v49 }
 0x1b8   : > { %v892_v41 = vmul.f32 %v2305_v47, %v891_v54  ;;  %v889_v55 = vsel %vm888_vm13, %v2303_v31, %v885_v53 }
 0x1b9   : > { %v1022_v59 = vmul.f32 %v889_v55, %v2725_v46 }
 0x1ba   : > { %v893_v0 = vmul.f32 0.5, %v892_v41  ;;  %v800_v60 = vpop.xlane.xlu2 %799 }
 0x1bb   : > { %v833_v61 = vmul.f32 %v2789_v56, %v800_v60  ;;  %v2821_v4 = vmul.f32 %v2802_v29, %v1022_v59 }
 0x1bc   : > { %v894_v1 = vsub.f32 1.5, %v893_v0 }
 0x1bd   : > { %v2307_v5 = vpop.eup %2306  ;;  %v849_v7 = vadd.f32 1e-06, %v833_v61  ;;  %v1058_v8 = vmul.f32 %v2821_v4, %v2821_v4 }
 0x1be   : > { %v895_v9 = vmul.f32 %v2305_v47, %v894_v1  ;;  %v901_v2 = vmul.f32 %v2307_v5, %v848_v49  ;;  %vm907_vm1 = vweird.f32 %v2307_v5 }
 0x1bf   : > { %2308 = vrsqrt.f32 %v849_v7  ;;  %1076 = vadd.xlane.f32.xlu0 %v1058_v8  ;;  %vm908_vm3 = vmor %vm906_vm2, %vm907_vm1  ;;  %vm916_vm5 = vweird.f32 %v849_v7 }
 0x1c0   : > { %v902_v46 = vmul.f32 %v2307_v5, %v901_v2  ;;  %v899_v33 = vsel %vm898_vm0, %v2305_v47, %v895_v9 }
 0x1c1   : > { %v1023_v12 = vmul.f32 %v899_v33, %v2730_v52 }
 0x1c2   : > { %v903_v13 = vmul.f32 0.5, %v902_v46  ;;  %v802_v14 = vpop.xlane.xlu0 %801 }
 0x1c3   : > { %v834_v15 = vmul.f32 %v2789_v56, %v802_v14  ;;  %v2828_v16 = vmul.f32 %v2802_v29, %v1023_v12 }
 0x1c4   : > { %v904_v17 = vsub.f32 1.5, %v903_v13 }
 0x1c5   : > { %v2309_v18 = vpop.eup %2308  ;;  %v850_v19 = vadd.f32 1e-06, %v834_v15  ;;  %v1059_v21 = vmul.f32 %v2828_v16, %v2828_v16 }
 0x1c6   : > { %v905_v22 = vmul.f32 %v2307_v5, %v904_v17  ;;  %v911_v23 = vmul.f32 %v2309_v18, %v849_v7  ;;  %vm917_vm4 = vweird.f32 %v2309_v18 }
 0x1c7   : > { %2310 = vrsqrt.f32 %v850_v19  ;;  %1078 = vadd.xlane.f32.xlu1 %v1059_v21  ;;  %vm918_vm6 = vmor %vm916_vm5, %vm917_vm4  ;;  %vm926_vm8 = vweird.f32 %v850_v19 }
 0x1c8   : > { %v912_v52 = vmul.f32 %v2309_v18, %v911_v23  ;;  %v909_v25 = vsel %vm908_vm3, %v2307_v5, %v905_v22 }
 0x1c9   : > { %v1024_v48 = vmul.f32 %v909_v25, %v2735_v58 }
 0x1ca   : > { %v913_v26 = vmul.f32 0.5, %v912_v52  ;;  %v804_v30 = vpop.xlane.xlu1 %803 }
 0x1cb   : > { %v835_v31 = vmul.f32 %v2789_v56, %v804_v30  ;;  %v2835_v57 = vmul.f32 %v2802_v29, %v1024_v48 }
 0x1cc   : > { %v914_v32 = vsub.f32 1.5, %v913_v26 }
 0x1cd   : > { %v2311_v36 = vpop.eup %2310  ;;  %v851_v37 = vadd.f32 1e-06, %v835_v31  ;;  %v1060_v10 = vmul.f32 %v2835_v57, %v2835_v57 }
 0x1ce   : > { %v915_v34 = vmul.f32 %v2309_v18, %v914_v32  ;;  %v921_v38 = vmul.f32 %v2311_v36, %v850_v19  ;;  %vm927_vm7 = vweird.f32 %v2311_v36 }
 0x1cf   : > { %2312 = vrsqrt.f32 %v851_v37  ;;  %1080 = vadd.xlane.f32.xlu2 %v1060_v10  ;;  %vm928_vm9 = vmor %vm926_vm8, %vm927_vm7  ;;  %vm936_vm11 = vweird.f32 %v851_v37 }
 0x1d0   : > { %v922_v58 = vmul.f32 %v2311_v36, %v921_v38  ;;  %v919_v39 = vsel %vm918_vm6, %v2309_v18, %v915_v34 }
 0x1d1   : > { %v1025_v40 = vmul.f32 %v919_v39, %v2740_v62 }
 0x1d2   : > { %v923_v43 = vmul.f32 0.5, %v922_v58  ;;  %v806_v45 = vpop.xlane.xlu2 %805 }
 0x1d3   : > { %v836_v47 = vmul.f32 %v2789_v56, %v806_v45  ;;  %v2842_v49 = vmul.f32 %v2802_v29, %v1025_v40 }
 0x1d4   : > { %v924_v50 = vsub.f32 1.5, %v923_v43 }
 0x1d5   : > { %v2313_v53 = vpop.eup %2312  ;;  %v852_v54 = vadd.f32 1e-06, %v836_v47  ;;  %v1061_v41 = vmul.f32 %v2842_v49, %v2842_v49 }
 0x1d6   : > { %v925_v55 = vmul.f32 %v2311_v36, %v924_v50  ;;  %v931_v59 = vmul.f32 %v2313_v53, %v851_v37  ;;  %vm937_vm10 = vweird.f32 %v2313_v53 }
 0x1d7   : > { %2314 = vrsqrt.f32 %v852_v54  ;;  %1082 = vadd.xlane.f32.xlu0 %v1061_v41  ;;  %vm938_vm12 = vmor %vm936_vm11, %vm937_vm10  ;;  %vm946_vm14 = vweird.f32 %v852_v54 }
 0x1d8   : > { %v932_v62 = vmul.f32 %v2313_v53, %v931_v59  ;;  %v929_v0 = vsel %vm928_vm9, %v2311_v36, %v925_v55 }
 0x1d9   : > { %v1026_v60 = vmul.f32 %v929_v0, %v2745_v6 }
 0x1da   : > { %v933_v61 = vmul.f32 0.5, %v932_v62  ;;  %v808_v1 = vpop.xlane.xlu0 %807 }
 0x1db   : > { %v837_v5 = vmul.f32 %v2789_v56, %v808_v1  ;;  %v2849_v7 = vmul.f32 %v2802_v29, %v1026_v60 }
 0x1dc   : > { %v934_v8 = vsub.f32 1.5, %v933_v61 }
 0x1dd   : > { %v2315_v9 = vpop.eup %2314  ;;  %v853_v2 = vadd.f32 1e-06, %v837_v5  ;;  %v1062_v46 = vmul.f32 %v2849_v7, %v2849_v7 }
 0x1de   : > { %v935_v33 = vmul.f32 %v2313_v53, %v934_v8  ;;  %v941_v12 = vmul.f32 %v2315_v9, %v852_v54  ;;  %vm947_vm13 = vweird.f32 %v2315_v9 }
 0x1df   : > { %2316 = vrsqrt.f32 %v853_v2  ;;  %1084 = vadd.xlane.f32.xlu1 %v1062_v46  ;;  %vm948_vm15 = vmor %vm946_vm14, %vm947_vm13  ;;  %vm956_vm1 = vweird.f32 %v853_v2 }
 0x1e0   : > { %v942_v6 = vmul.f32 %v2315_v9, %v941_v12  ;;  %v939_v13 = vsel %vm938_vm12, %v2313_v53, %v935_v33 }
 0x1e1   : > { %v1027_v14 = vmul.f32 %v939_v13, %v2750_v11 }
 0x1e2   : > { %v943_v15 = vmul.f32 0.5, %v942_v6  ;;  %v810_v17 = vpop.xlane.xlu1 %809 }
 0x1e3   : > { %v838_v18 = vmul.f32 %v2789_v56, %v810_v17  ;;  %v2856_v19 = vmul.f32 %v2802_v29, %v1027_v14 }
 0x1e4   : > { %v944_v21 = vsub.f32 1.5, %v943_v15 }
 0x1e5   : > { %v2317_v22 = vpop.eup %2316  ;;  %v854_v23 = vadd.f32 1e-06, %v838_v18  ;;  %v1063_v52 = vmul.f32 %v2856_v19, %v2856_v19 }
 0x1e6   : > { %v945_v25 = vmul.f32 %v2315_v9, %v944_v21  ;;  %v951_v48 = vmul.f32 %v2317_v22, %v853_v2  ;;  %vm957_vm0 = vweird.f32 %v2317_v22 }
 0x1e7   : > { %2318 = vrsqrt.f32 %v854_v23  ;;  %1086 = vadd.xlane.f32.xlu2 %v1063_v52  ;;  %vm958_vm2 = vmor %vm956_vm1, %vm957_vm0  ;;  %vm966_vm4 = vweird.f32 %v854_v23 }
 0x1e8   : > { %v952_v11 = vmul.f32 %v2317_v22, %v951_v48  ;;  %v949_v26 = vsel %vm948_vm15, %v2315_v9, %v945_v25 }
 0x1e9   : > { %v1028_v30 = vmul.f32 %v949_v26, %v2755_v3 }
 0x1ea   : > { %v953_v31 = vmul.f32 0.5, %v952_v11  ;;  %v812_v32 = vpop.xlane.xlu2 %811 }
 0x1eb   : > { %v839_v36 = vmul.f32 %v2789_v56, %v812_v32  ;;  %v2863_v37 = vmul.f32 %v2802_v29, %v1028_v30 }
 0x1ec   : > { %v954_v10 = vsub.f32 1.5, %v953_v31 }
 0x1ed   : > { %v2319_v34 = vpop.eup %2318  ;;  %v855_v38 = vadd.f32 1e-06, %v839_v36  ;;  %v1064_v58 = vmul.f32 %v2863_v37, %v2863_v37 }
 0x1ee   : > { %v955_v39 = vmul.f32 %v2317_v22, %v954_v10  ;;  %v961_v40 = vmul.f32 %v2319_v34, %v854_v23  ;;  %vm967_vm3 = vweird.f32 %v2319_v34 }
 0x1ef   : > { %2320 = vrsqrt.f32 %v855_v38  ;;  %1088 = vadd.xlane.f32.xlu0 %v1064_v58  ;;  %vm968_vm5 = vmor %vm966_vm4, %vm967_vm3  ;;  %vm976_vm7 = vweird.f32 %v855_v38 }
 0x1f0   : > { %v962_v3 = vmul.f32 %v2319_v34, %v961_v40  ;;  %v959_v43 = vsel %vm958_vm2, %v2317_v22, %v955_v39 }
 0x1f1   : > { %v1029_v45 = vmul.f32 %v959_v43, %v2760_v20 }
 0x1f2   : > { %v963_v47 = vmul.f32 0.5, %v962_v3  ;;  %v814_v50 = vpop.xlane.xlu0 %813 }
 0x1f3   : > { %v840_v53 = vmul.f32 %v2789_v56, %v814_v50  ;;  %v2870_v54 = vmul.f32 %v2802_v29, %v1029_v45 }
 0x1f4   : > { %v964_v41 = vsub.f32 1.5, %v963_v47 }
 0x1f5   : > { %v2321_v55 = vpop.eup %2320  ;;  %v856_v59 = vadd.f32 1e-06, %v840_v53  ;;  %v1065_v62 = vmul.f32 %v2870_v54, %v2870_v54 }
 0x1f6   : > { %v965_v0 = vmul.f32 %v2319_v34, %v964_v41  ;;  %v971_v60 = vmul.f32 %v2321_v55, %v855_v38  ;;  %vm977_vm6 = vweird.f32 %v2321_v55 }
 0x1f7   : > { %2322 = vrsqrt.f32 %v856_v59  ;;  %1090 = vadd.xlane.f32.xlu1 %v1065_v62  ;;  %vm978_vm8 = vmor %vm976_vm7, %vm977_vm6  ;;  %vm986_vm10 = vweird.f32 %v856_v59 }
 0x1f8   : > { %v972_v20 = vmul.f32 %v2321_v55, %v971_v60  ;;  %v969_v61 = vsel %vm968_vm5, %v2319_v34, %v965_v0 }
 0x1f9   : > { %v1030_v1 = vmul.f32 %v969_v61, %v2765_v24 }
 0x1fa   : > { %v973_v5 = vmul.f32 0.5, %v972_v20  ;;  %v816_v8 = vpop.xlane.xlu1 %815 }
 0x1fb   : > { %v841_v9 = vmul.f32 %v2789_v56, %v816_v8  ;;  %v2877_v2 = vmul.f32 %v2802_v29, %v1030_v1 }
 0x1fc   : > { %v974_v46 = vsub.f32 1.5, %v973_v5 }
 0x1fd   : > { %v2323_v33 = vpop.eup %2322  ;;  %v857_v12 = vadd.f32 1e-06, %v841_v9  ;;  %v1066_v6 = vmul.f32 %v2877_v2, %v2877_v2 }
 0x1fe   : > { %v975_v13 = vmul.f32 %v2321_v55, %v974_v46  ;;  %v981_v14 = vmul.f32 %v2323_v33, %v856_v59  ;;  %vm987_vm9 = vweird.f32 %v2323_v33 }
 0x1ff   : > { %2324 = vrsqrt.f32 %v857_v12  ;;  %1092 = vadd.xlane.f32.xlu2 %v1066_v6  ;;  %vm988_vm11 = vmor %vm986_vm10, %vm987_vm9  ;;  %vm996_vm13 = vweird.f32 %v857_v12 }
 0x200   : > { %v982_v24 = vmul.f32 %v2323_v33, %v981_v14  ;;  %v979_v15 = vsel %vm978_vm8, %v2321_v55, %v975_v13 }
 0x201   : > { %v1031_v17 = vmul.f32 %v979_v15, %v2770_v28 }
 0x202   : > { %v983_v18 = vmul.f32 0.5, %v982_v24  ;;  %v818_v21 = vpop.xlane.xlu2 %817 }
 0x203   : > { %v842_v22 = vmul.f32 %v2789_v56, %v818_v21  ;;  %v2884_v23 = vmul.f32 %v2802_v29, %v1031_v17 }
 0x204   : > { %v984_v52 = vsub.f32 1.5, %v983_v18 }
 0x205   : > { %v2325_v25 = vpop.eup %2324  ;;  %v858_v48 = vadd.f32 1e-06, %v842_v22  ;;  %v1067_v11 = vmul.f32 %v2884_v23, %v2884_v23 }
 0x206   : > { %v985_v26 = vmul.f32 %v2323_v33, %v984_v52  ;;  %v991_v30 = vmul.f32 %v2325_v25, %v857_v12  ;;  %vm997_vm12 = vweird.f32 %v2325_v25 }
 0x207   : > { %2326 = vrsqrt.f32 %v858_v48  ;;  %1094 = vadd.xlane.f32.xlu0 %v1067_v11  ;;  %vm998_vm14 = vmor %vm996_vm13, %vm997_vm12  ;;  %vm1006_vm0 = vweird.f32 %v858_v48 }
 0x208   : > { %v992_v28 = vmul.f32 %v2325_v25, %v991_v30  ;;  %v989_v31 = vsel %vm988_vm11, %v2323_v33, %v985_v26 }
 0x209   : > { %v1032_v32 = vmul.f32 %v989_v31, %v2775_v35 }
 0x20a   : > { %v993_v36 = vmul.f32 0.5, %v992_v28  ;;  %v820_v10 = vpop.xlane.xlu0 %819 }
 0x20b   : > { %v843_v34 = vmul.f32 %v2789_v56, %v820_v10  ;;  %v2891_v38 = vmul.f32 %v2802_v29, %v1032_v32 }
 0x20c   : > { %v994_v58 = vsub.f32 1.5, %v993_v36 }
 0x20d   : > { %v2327_v39 = vpop.eup %2326  ;;  %v859_v40 = vadd.f32 1e-06, %v843_v34  ;;  %v1068_v3 = vmul.f32 %v2891_v38, %v2891_v38 }
 0x20e   : > { %v995_v43 = vmul.f32 %v2325_v25, %v994_v58  ;;  %v1001_v45 = vmul.f32 %v2327_v39, %v858_v48  ;;  %vm1007_vm15 = vweird.f32 %v2327_v39 }
 0x20f   : > { %2328 = vrsqrt.f32 %v859_v40  ;;  %1096 = vadd.xlane.f32.xlu1 %v1068_v3  ;;  %vm1008_vm1 = vmor %vm1006_vm0, %vm1007_vm15  ;;  %vm1016_vm3 = vweird.f32 %v859_v40 }
 0x210   : > { %v1002_v35 = vmul.f32 %v2327_v39, %v1001_v45  ;;  %v999_v47 = vsel %vm998_vm14, %v2325_v25, %v995_v43 }
 0x211   : > { %v1033_v50 = vmul.f32 %v999_v47, %v2780_v42 }
 0x212   : > { %v1003_v53 = vmul.f32 0.5, %v1002_v35 }
 0x213   : > { %v2897_v41 = vmul.f32 %v2802_v29, %v1033_v50 }
 0x214   : > { %v1004_v55 = vsub.f32 1.5, %v1003_v53 }
 0x215   : > { %v2329_v59 = vpop.eup %2328  ;;  %v1069_v62 = vmul.f32 %v2897_v41, %v2897_v41 }
 0x216   : > { %v1005_v0 = vmul.f32 %v2327_v39, %v1004_v55  ;;  %v1011_v60 = vmul.f32 %v2329_v59, %v859_v40  ;;  %vm1017_vm2 = vweird.f32 %v2329_v59 }
 0x217   : > { %1098 = vadd.xlane.f32.xlu2 %v1069_v62  ;;  %vm1018_vm4 = vmor %vm1016_vm3, %vm1017_vm2 }
 0x218   : > { %v1012_v20 = vmul.f32 %v2329_v59, %v1011_v60  ;;  %v1009_v61 = vsel %vm1008_vm1, %v2327_v39, %v1005_v0 }
 0x219   : > { %v1034_v1 = vmul.f32 %v1009_v61, %v2785_v51 }
 0x21a   : > { %v1013_v42 = vmul.f32 0.5, %v1012_v20 }
 0x21b   : > { %v2903_v5 = vmul.f32 %v2802_v29, %v1034_v1 }
 0x21c   : > { %v1014_v8 = vsub.f32 1.5, %v1013_v42 }
 0x21d   : > { %v1070_v9 = vmul.f32 %v2903_v5, %v2903_v5 }
 0x21e   : > { %v1015_v46 = vmul.f32 %v2329_v59, %v1014_v8 }
 0x21f   : > { %1100 = vadd.xlane.f32.xlu0 %v1070_v9 }
 0x220   : > { %v1019_v33 = vsel %vm1018_vm4, %v2329_v59, %v1015_v46 }
 0x221   : > { %v1035_v12 = vmul.f32 %v1019_v33, %v2793_v63 }
 0x222   : > { %v1073_v6 = vpop.xlane.xlu1 %1072 }
 0x223   : > { %v1104_v13 = vmul.f32 %v1073_v6, %v2789_v56  ;;  %v2910_v51 = vmul.f32 %v2802_v29, %v1035_v12 }
 0x225   : > { %v1120_v14 = vadd.f32 1e-06, %v1104_v13  ;;  %v1071_v24 = vmul.f32 %v2910_v51, %v2910_v51 }
 0x227   : > { %2330 = vrsqrt.f32 %v1120_v14  ;;  %1102 = vadd.xlane.f32.xlu1 %v1071_v24  ;;  %vm1142_vm6 = vweird.f32 %v1120_v14 }
 0x22a   : > { %v1075_v15 = vpop.xlane.xlu2 %1074 }
 0x22b   : > { %v1105_v17 = vmul.f32 %v1075_v15, %v2789_v56 }
 0x22d   : > { %v2331_v18 = vpop.eup %2330  ;;  %v1121_v21 = vadd.f32 1e-06, %v1105_v17 }
 0x22e   : > { %v1137_v22 = vmul.f32 %v2331_v18, %v1120_v14  ;;  %vm1143_vm5 = vweird.f32 %v2331_v18 }
 0x22f   : > { %2332 = vrsqrt.f32 %v1121_v21  ;;  %vm1144_vm7 = vmor %vm1142_vm6, %vm1143_vm5  ;;  %vm1152_vm9 = vweird.f32 %v1121_v21 }
 0x230   : > { %v1138_v63 = vmul.f32 %v2331_v18, %v1137_v22 }
 0x232   : > { %v1139_v52 = vmul.f32 0.5, %v1138_v63  ;;  %v1077_v25 = vpop.xlane.xlu0 %1076 }
 0x233   : > { %v1106_v48 = vmul.f32 %v1077_v25, %v2789_v56 }
 0x234   : > { %v1140_v29 = vsub.f32 1.5, %v1139_v52 }
 0x235   : > { %v2333_v11 = vpop.eup %2332  ;;  %v1122_v26 = vadd.f32 1e-06, %v1106_v48 }
 0x236   : > { %v1147_v30 = vmul.f32 %v2333_v11, %v1121_v21  ;;  %v1141_v28 = vmul.f32 %v2331_v18, %v1140_v29  ;;  %vm1153_vm8 = vweird.f32 %v2333_v11 }
 0x237   : > { %2334 = vrsqrt.f32 %v1122_v26  ;;  %vm1154_vm10 = vmor %vm1152_vm9, %vm1153_vm8  ;;  %vm1162_vm12 = vweird.f32 %v1122_v26 }
 0x238   : > { %v1148_v31 = vmul.f32 %v2333_v11, %v1147_v30  ;;  %v1145_v34 = vsel %vm1144_vm7, %v2331_v18, %v1141_v28 }
 0x239   : > { %v1296_v43 = vmul.f32 %v1145_v34, %v2807_v27 }
 0x23a   : > { %v1149_v32 = vmul.f32 0.5, %v1148_v31  ;;  %v1079_v36 = vpop.xlane.xlu1 %1078 }
 0x23b   : > { %v1107_v10 = vmul.f32 %v1079_v36, %v2789_v56 }
 0x23c   : > { %v1150_v58 = vsub.f32 1.5, %v1149_v32 }
 0x23d   : > { %v2335_v39 = vpop.eup %2334  ;;  %v1123_v40 = vadd.f32 1e-06, %v1107_v10 }
 0x23e   : > { %v1157_v3 = vmul.f32 %v2335_v39, %v1122_v26  ;;  %v1151_v45 = vmul.f32 %v2333_v11, %v1150_v58  ;;  %vm1163_vm11 = vweird.f32 %v2335_v39 }
 0x23f   : > { %2336 = vrsqrt.f32 %v1123_v40  ;;  %vm1164_vm13 = vmor %vm1162_vm12, %vm1163_vm11  ;;  %vm1172_vm15 = vweird.f32 %v1123_v40 }
 0x240   : > { %v1158_v35 = vmul.f32 %v2335_v39, %v1157_v3  ;;  %1312 = vxpose.xlu2.b32.start [1/16] %v1296_v43, 128  ;;  %v1155_v55 = vsel %vm1154_vm10, %v2333_v11, %v1151_v45 }
 0x241   : > { %v1297_v20 = vmul.f32 %v1155_v55, %v2814_v44 }
 0x242   : > { %v1159_v47 = vmul.f32 0.5, %v1158_v35  ;;  %v1081_v50 = vpop.xlane.xlu2 %1080 }
 0x243   : > { %v1108_v53 = vmul.f32 %v1081_v50, %v2789_v56 }
 0x244   : > { %v1160_v59 = vsub.f32 1.5, %v1159_v47 }
 0x245   : > { %v2337_v62 = vpop.eup %2336  ;;  %v1124_v0 = vadd.f32 1e-06, %v1108_v53 }
 0x246   : > { %v1167_v60 = vmul.f32 %v2337_v62, %v1123_v40  ;;  %v1161_v27 = vmul.f32 %v2335_v39, %v1160_v59  ;;  %vm1173_vm14 = vweird.f32 %v2337_v62 }
 0x247   : > { %2338 = vrsqrt.f32 %v1124_v0  ;;  %vm1174_vm0 = vmor %vm1172_vm15, %vm1173_vm14  ;;  %vm1182_vm2 = vweird.f32 %v1124_v0 }
 0x248   : > { %v1168_v61 = vmul.f32 %v2337_v62, %v1167_v60  ;;  %1313 = vxpose.xlu2.b32.cont [2/16] %v1297_v20, 128  ;;  %v1165_v9 = vsel %vm1164_vm13, %v2335_v39, %v1161_v27 }
 0x249   : > { %v1298_v13 = vmul.f32 %v1165_v9, %v2821_v4 }
 0x24a   : > { %v1169_v1 = vmul.f32 0.5, %v1168_v61  ;;  %v1083_v42 = vpop.xlane.xlu0 %1082 }
 0x24b   : > { %v1109_v8 = vmul.f32 %v1083_v42, %v2789_v56 }
 0x24c   : > { %v1170_v46 = vsub.f32 1.5, %v1169_v1 }
 0x24d   : > { %v2339_v33 = vpop.eup %2338  ;;  %v1125_v12 = vadd.f32 1e-06, %v1109_v8 }
 0x24e   : > { %v1177_v6 = vmul.f32 %v2339_v33, %v1124_v0  ;;  %v1171_v44 = vmul.f32 %v2337_v62, %v1170_v46  ;;  %vm1183_vm1 = vweird.f32 %v2339_v33 }
 0x24f   : > { %2340 = vrsqrt.f32 %v1125_v12  ;;  %vm1184_vm3 = vmor %vm1182_vm2, %vm1183_vm1  ;;  %vm1192_vm5 = vweird.f32 %v1125_v12 }
 0x250   : > { %v1178_v14 = vmul.f32 %v2339_v33, %v1177_v6  ;;  %1314 = vxpose.xlu2.b32.cont [3/16] %v1298_v13, 128  ;;  %v1175_v18 = vsel %vm1174_vm0, %v2337_v62, %v1171_v44 }
 0x251   : > { %v1299_v25 = vmul.f32 %v1175_v18, %v2828_v16 }
 0x252   : > { %v1179_v24 = vmul.f32 0.5, %v1178_v14  ;;  %v1085_v15 = vpop.xlane.xlu1 %1084 }
 0x253   : > { %v1110_v17 = vmul.f32 %v1085_v15, %v2789_v56 }
 0x254   : > { %v1180_v21 = vsub.f32 1.5, %v1179_v24 }
 0x255   : > { %v2341_v22 = vpop.eup %2340  ;;  %v1126_v63 = vadd.f32 1e-06, %v1110_v17 }
 0x256   : > { %v1187_v52 = vmul.f32 %v2341_v22, %v1125_v12  ;;  %v1181_v4 = vmul.f32 %v2339_v33, %v1180_v21  ;;  %vm1193_vm4 = vweird.f32 %v2341_v22 }
 0x257   : > { %2342 = vrsqrt.f32 %v1126_v63  ;;  %vm1194_vm6 = vmor %vm1192_vm5, %vm1193_vm4  ;;  %vm1202_vm8 = vweird.f32 %v1126_v63 }
 0x258   : > { %v1188_v48 = vmul.f32 %v2341_v22, %v1187_v52  ;;  %1315 = vxpose.xlu2.b32.cont [4/16] %v1299_v25, 128  ;;  %v1185_v30 = vsel %vm1184_vm3, %v2339_v33, %v1181_v4 }
 0x259   : > { %v1300_v10 = vmul.f32 %v1185_v30, %v2835_v57 }
 0x25a   : > { %v1189_v29 = vmul.f32 0.5, %v1188_v48  ;;  %v1087_v11 = vpop.xlane.xlu2 %1086 }
 0x25b   : > { %v1111_v26 = vmul.f32 %v1087_v11, %v2789_v56 }
 0x25c   : > { %v1190_v28 = vsub.f32 1.5, %v1189_v29 }
 0x25d   : > { %v2343_v31 = vpop.eup %2342  ;;  %v1127_v32 = vadd.f32 1e-06, %v1111_v26 }
 0x25e   : > { %v1197_v36 = vmul.f32 %v2343_v31, %v1126_v63  ;;  %v1191_v16 = vmul.f32 %v2341_v22, %v1190_v28  ;;  %vm1203_vm7 = vweird.f32 %v2343_v31 }
 0x25f   : > { %2344 = vrsqrt.f32 %v1127_v32  ;;  %vm1204_vm9 = vmor %vm1202_vm8, %vm1203_vm7  ;;  %vm1212_vm11 = vweird.f32 %v1127_v32 }
 0x260   : > { %v1198_v34 = vmul.f32 %v2343_v31, %v1197_v36  ;;  %1316 = vxpose.xlu2.b32.cont [5/16] %v1300_v10, 128  ;;  %v1195_v3 = vsel %vm1194_vm6, %v2341_v22, %v1191_v16 }
 0x261   : > { %v1301_v50 = vmul.f32 %v1195_v3, %v2842_v49 }
 0x262   : > { %v1199_v58 = vmul.f32 0.5, %v1198_v34  ;;  %v1089_v39 = vpop.xlane.xlu0 %1088 }
 0x263   : > { %v1112_v40 = vmul.f32 %v1089_v39, %v2789_v56 }
 0x264   : > { %v1200_v43 = vsub.f32 1.5, %v1199_v58 }
 0x265   : > { %v2345_v45 = vpop.eup %2344  ;;  %v1128_v35 = vadd.f32 1e-06, %v1112_v40 }
 0x266   : > { %v1207_v47 = vmul.f32 %v2345_v45, %v1127_v32  ;;  %v1201_v57 = vmul.f32 %v2343_v31, %v1200_v43  ;;  %vm1213_vm10 = vweird.f32 %v2345_v45 }
 0x267   : > { %2346 = vrsqrt.f32 %v1128_v35  ;;  %vm1214_vm12 = vmor %vm1212_vm11, %vm1213_vm10  ;;  %vm1222_vm14 = vweird.f32 %v1128_v35 }
 0x268   : > { %v1208_v53 = vmul.f32 %v2345_v45, %v1207_v47  ;;  %1317 = vxpose.xlu2.b32.cont [6/16] %v1301_v50, 128  ;;  %v1205_v0 = vsel %vm1204_vm9, %v2343_v31, %v1201_v57 }
 0x269   : > { %v1302_v1 = vmul.f32 %v1205_v0, %v2849_v7 }
 0x26a   : > { %v1209_v55 = vmul.f32 0.5, %v1208_v53  ;;  %v1091_v59 = vpop.xlane.xlu1 %1090 }
 0x26b   : > { %v1113_v62 = vmul.f32 %v1091_v59, %v2789_v56 }
 0x26c   : > { %v1210_v60 = vsub.f32 1.5, %v1209_v55 }
 0x26d   : > { %v2347_v20 = vpop.eup %2346  ;;  %v1129_v27 = vadd.f32 1e-06, %v1113_v62 }
 0x26e   : > { %v1217_v61 = vmul.f32 %v2347_v20, %v1128_v35  ;;  %v1211_v49 = vmul.f32 %v2345_v45, %v1210_v60  ;;  %vm1223_vm13 = vweird.f32 %v2347_v20 }
 0x26f   : > { %2348 = vrsqrt.f32 %v1129_v27  ;;  %vm1224_vm15 = vmor %vm1222_vm14, %vm1223_vm13  ;;  %vm1232_vm1 = vweird.f32 %v1129_v27 }
 0x270   : > { %v1218_v42 = vmul.f32 %v2347_v20, %v1217_v61  ;;  %1318 = vxpose.xlu2.b32.cont [7/16] %v1302_v1, 128  ;;  %v1215_v33 = vsel %vm1214_vm12, %v2345_v45, %v1211_v49 }
 0x271   : > { %v1303_v14 = vmul.f32 %v1215_v33, %v2856_v19 }
 0x272   : > { %v1219_v8 = vmul.f32 0.5, %v1218_v42  ;;  %v1093_v9 = vpop.xlane.xlu2 %1092 }
 0x273   : > { %v1114_v46 = vmul.f32 %v1093_v9, %v2789_v56 }
 0x274   : > { %v1220_v12 = vsub.f32 1.5, %v1219_v8 }
 0x275   : > { %v2349_v6 = vpop.eup %2348  ;;  %v1130_v13 = vadd.f32 1e-06, %v1114_v46 }
 0x276   : > { %v1227_v44 = vmul.f32 %v2349_v6, %v1129_v27  ;;  %v1221_v7 = vmul.f32 %v2347_v20, %v1220_v12  ;;  %vm1233_vm0 = vweird.f32 %v2349_v6 }
 0x277   : > { %2350 = vrsqrt.f32 %v1130_v13  ;;  %vm1234_vm2 = vmor %vm1232_vm1, %vm1233_vm0  ;;  %vm1242_vm4 = vweird.f32 %v1130_v13 }
 0x278   : > { %v1228_v24 = vmul.f32 %v2349_v6, %v1227_v44  ;;  %1319 = vxpose.xlu2.b32.cont [8/16] %v1303_v14, 128  ;;  %v1225_v21 = vsel %vm1224_vm15, %v2347_v20, %v1221_v7 }
 0x279   : > { %v1304_v4 = vmul.f32 %v1225_v21, %v2863_v37 }
 0x27a   : > { %v1229_v15 = vmul.f32 0.5, %v1228_v24  ;;  %v1095_v17 = vpop.xlane.xlu0 %1094 }
 0x27b   : > { %v1115_v18 = vmul.f32 %v1095_v17, %v2789_v56 }
 0x27c   : > { %v1230_v22 = vsub.f32 1.5, %v1229_v15 }
 0x27d   : > { %v2351_v63 = vpop.eup %2350  ;;  %v1131_v52 = vadd.f32 1e-06, %v1115_v18 }
 0x27e   : > { %v1237_v25 = vmul.f32 %v2351_v63, %v1130_v13  ;;  %v1231_v19 = vmul.f32 %v2349_v6, %v1230_v22  ;;  %vm1243_vm3 = vweird.f32 %v2351_v63 }
 0x27f   : > { %2352 = vrsqrt.f32 %v1131_v52  ;;  %vm1244_vm5 = vmor %vm1242_vm4, %vm1243_vm3  ;;  %vm1252_vm7 = vweird.f32 %v1131_v52 }
 0x280   : > { %v1238_v48 = vmul.f32 %v2351_v63, %v1237_v25  ;;  %1320 = vxpose.xlu2.b32.cont [9/16] %v1304_v4, 128  ;;  %v1235_v30 = vsel %vm1234_vm2, %v2349_v6, %v1231_v19  ;;  %v1385_v19 = vld [vmem:[%s3198_s5 + $0x8] sm:$0xff] }
 0x281   : > { %v1305_v10 = vmul.f32 %v1235_v30, %v2870_v54 }
 0x282   : > { %v1239_v29 = vmul.f32 0.5, %v1238_v48  ;;  %v1097_v11 = vpop.xlane.xlu1 %1096  ;;  %v2444_v48 = vmov 0  }
 0x283   : > { %v1116_v26 = vmul.f32 %v1097_v11, %v2789_v56  ;;  %2293 = vset.pattern.permute.xlu1 %v2444_v48  ;;  %2292 = vset.pattern.permute.xlu0 %v2444_v48  ;;  %v1386_v11 = vld [vmem:[%s3198_s5 + $0x10] sm:$0xff] }
 0x284   : > { %v1240_v28 = vsub.f32 1.5, %v1239_v29  ;;  %1423 = vperm.xlu1 %2293, %v1385_v19  }
 0x285   : > { %v2353_v31 = vpop.eup %2352  ;;  %v1132_v32 = vadd.f32 1e-06, %v1116_v26 }
 0x286   : > { %v1247_v36 = vmul.f32 %v2353_v31, %v1131_v52  ;;  %v1241_v37 = vmul.f32 %v2351_v63, %v1240_v28  ;;  %vm1253_vm6 = vweird.f32 %v2353_v31 }
 0x287   : > { %2354 = vrsqrt.f32 %v1132_v32  ;;  %vm1254_vm8 = vmor %vm1252_vm7, %vm1253_vm6  ;;  %vm1262_vm10 = vweird.f32 %v1132_v32 }
 0x288   : > { %v1248_v16 = vmul.f32 %v2353_v31, %v1247_v36  ;;  %1321 = vxpose.xlu2.b32.cont [10/16] %v1305_v10, 128  ;;  %v1245_v40 = vsel %vm1244_vm5, %v2351_v63, %v1241_v37  ;;  %v1384_v36 = vld [vmem:[%s3198_s5] sm:$0xff]  ;;  %v1391_v10 = vld [vmem:[%s3198_s5 + $0x38] sm:$0xff] }
 0x289   : > { %v1306_v47 = vmul.f32 %v1245_v40, %v2877_v2  ;;  %1418 = vperm.xlu0 %2292, %v1384_v36   ;;  %v1390_v40 = vld [vmem:[%s3198_s5 + $0x30] sm:$0xff] }
 0x28a   : > { %v1249_v34 = vmul.f32 0.5, %v1248_v16  ;;  %v1099_v58 = vpop.xlane.xlu2 %1098 }
 0x28b   : > { %v1117_v39 = vmul.f32 %v1099_v58, %v2789_v56  ;;  %v1393_v58 = vld [vmem:[%s3198_s5 + $0x48] sm:$0xff] }
 0x28c   : > { %v1250_v3 = vsub.f32 1.5, %v1249_v34  ;;  %1428 = vperm.xlu1 %2293, %v1386_v11   ;;  %v1388_v34 = vld [vmem:[%s3198_s5 + $0x20] sm:$0xff] }
 0x28d   : > { %v2355_v43 = vpop.eup %2354  ;;  %v1133_v45 = vadd.f32 1e-06, %v1117_v39 }
 0x28e   : > { %v1257_v35 = vmul.f32 %v2355_v43, %v1132_v32  ;;  %v1251_v54 = vmul.f32 %v2353_v31, %v1250_v3  ;;  %vm1263_vm9 = vweird.f32 %v2355_v43  ;;  %v1395_v3 = vld [vmem:[%s3198_s5 + $0x58] sm:$0xff] }
 0x28f   : > { %2356 = vrsqrt.f32 %v1133_v45  ;;  %vm1264_vm11 = vmor %vm1262_vm10, %vm1263_vm9  ;;  %vm1272_vm13 = vweird.f32 %v1133_v45 }
 0x290   : > { %v1258_v50 = vmul.f32 %v2355_v43, %v1257_v35  ;;  %1322 = vxpose.xlu2.b32.cont [11/16] %v1306_v47, 128  ;;  %v1255_v59 = vsel %vm1254_vm8, %v2353_v31, %v1251_v54  ;;  %v1389_v31 = vld [vmem:[%s3198_s5 + $0x28] sm:$0xff]  ;;  %v1392_v35 = vld [vmem:[%s3198_s5 + $0x40] sm:$0xff] }
 0x291   : > { %v1307_v27 = vmul.f32 %v1255_v59, %v2884_v23  ;;  %1438 = vperm.xlu0 %2292, %v1388_v34   ;;  %v1397_v47 = vld [vmem:[%s3198_s5 + $0x68] sm:$0xff] }
 0x292   : > { %v1259_v57 = vmul.f32 0.5, %v1258_v50  ;;  %v1101_v53 = vpop.xlane.xlu0 %1100  ;;  %v1394_v50 = vld [vmem:[%s3198_s5 + $0x50] sm:$0xff]  ;;  %v1401_v59 = vld [vmem:[%s3198_s5 + $0x88] sm:$0xff] }
 0x293   : > { %v1118_v55 = vmul.f32 %v1101_v53, %v2789_v56 }
 0x294   : > { %v1260_v62 = vsub.f32 1.5, %v1259_v57  ;;  %v1399_v57 = vld [vmem:[%s3198_s5 + $0x78] sm:$0xff] }
 0x295   : > { %v2357_v0 = vpop.eup %2356  ;;  %v1134_v60 = vadd.f32 1e-06, %v1118_v55  ;;  %v1396_v55 = vld [vmem:[%s3198_s5 + $0x60] sm:$0xff] }
 0x296   : > { %v1267_v20 = vmul.f32 %v2357_v0, %v1133_v45  ;;  %v1261_v2 = vmul.f32 %v2355_v43, %v1260_v62  ;;  %vm1273_vm12 = vweird.f32 %v2357_v0 }
 0x297   : > { %2358 = vrsqrt.f32 %v1134_v60  ;;  %vm1274_vm14 = vmor %vm1272_vm13, %vm1273_vm12  ;;  %vm1282_vm0 = vweird.f32 %v1134_v60 }
 0x298   : > { %v1268_v61 = vmul.f32 %v2357_v0, %v1267_v20  ;;  %1323 = vxpose.xlu2.b32.cont [12/16] %v1307_v27, 128  ;;  %v1265_v8 = vsel %vm1264_vm11, %v2355_v43, %v1261_v2  ;;  %v1400_v27 = vld [vmem:[%s3198_s5 + $0x80] sm:$0xff]  ;;  %v1405_v2 = vld [vmem:[%s3198_s5 + $0xa8] sm:$0xff] }
 0x299   : > { %v1308_v6 = vmul.f32 %v1265_v8, %v2891_v38  ;;  %1448 = vperm.xlu0 %2292, %v1390_v40   ;;  %v1409_v8 = vld [vmem:[%s3198_s5 + $0xc8] sm:$0xff]  ;;  %v2119_v40 = vld [vmem:[%s3197_s4 + $0x38] sm:$0xff] }
 0x29a   : > { %v1269_v1 = vmul.f32 0.5, %v1268_v61  ;;  %v1103_v49 = vpop.xlane.xlu1 %1102  ;;  %v1402_v61 = vld [vmem:[%s3198_s5 + $0x90] sm:$0xff] }
 0x29b   : > { %v1119_v42 = vmul.f32 %v1103_v49, %v2789_v56 }
 0x29c   : > { %v1270_v9 = vsub.f32 1.5, %v1269_v1  ;;  %v1407_v1 = vld [vmem:[%s3198_s5 + $0xb8] sm:$0xff] }
 0x29d   : > { %v2359_v46 = vpop.eup %2358  ;;  %v1135_v33 = vadd.f32 1e-06, %v1119_v42  ;;  %v1404_v42 = vld [vmem:[%s3198_s5 + $0xa0] sm:$0xff] }
 0x29e   : > { %v1277_v12 = vmul.f32 %v2359_v46, %v1134_v60  ;;  %v1271_v23 = vmul.f32 %v2357_v0, %v1270_v9  ;;  %vm1283_vm15 = vweird.f32 %v2359_v46  ;;  %v1403_v60 = vld [vmem:[%s3198_s5 + $0x98] sm:$0xff] }
 0x29f   : > { %2360 = vrsqrt.f32 %v1135_v33  ;;  %vm1284_vm1 = vmor %vm1282_vm0, %vm1283_vm15  ;;  %vm1292_vm3 = vweird.f32 %v1135_v33 }
 0x2a0   : > { %v1278_v13 = vmul.f32 %v2359_v46, %v1277_v12  ;;  %1324 = vxpose.xlu2.b32.cont [13/16] %v1308_v6, 128  ;;  %v1275_v14 = vsel %vm1274_vm14, %v2357_v0, %v1271_v23  ;;  %v1398_v0 = vld [vmem:[%s3198_s5 + $0x70] sm:$0xff] }
 0x2a1   : > { %v1309_v56 = vmul.f32 %v1275_v14, %v2897_v41  ;;  %1458 = vperm.xlu0 %2292, %v1392_v35  }
 0x2a2   : > { %v1279_v44 = vmul.f32 0.5, %v1278_v13  ;;  %v1408_v13 = vld [vmem:[%s3198_s5 + $0xc0] sm:$0xff] }
 0x2a4   : > { %v1280_v7 = vsub.f32 1.5, %v1279_v44  ;;  %v1413_v44 = vld [vmem:[%s3198_s5 + $0xe8] sm:$0xff] }
 0x2a5   : > { %v2361_v24 = vpop.eup %2360 }
 0x2a6   : > { %v1287_v15 = vmul.f32 %v2361_v24, %v1135_v33  ;;  %v1281_v17 = vmul.f32 %v2359_v46, %v1280_v7  ;;  %vm1293_vm2 = vweird.f32 %v2361_v24  ;;  %v1411_v33 = vld [vmem:[%s3198_s5 + $0xd8] sm:$0xff] }
 0x2a7   : > { %vm1294_vm4 = vmor %vm1292_vm3, %vm1293_vm2 }
 0x2a8   : > { %v1288_v18 = vmul.f32 %v2361_v24, %v1287_v15  ;;  %1325 = vxpose.xlu2.b32.cont [14/16] %v1309_v56, 128  ;;  %v1285_v21 = vsel %vm1284_vm1, %v2359_v46, %v1281_v17  ;;  %v1406_v46 = vld [vmem:[%s3198_s5 + $0xb0] sm:$0xff]  ;;  %v1415_v15 = vld [vmem:[%s3198_s5 + $0xf8] sm:$0xff]  ;;  %v1412_v17 = vld [vmem:[%s3198_s5 + $0xe0] sm:$0xff] }
 0x2a9   : > { %v1310_v63 = vmul.f32 %v1285_v21, %v2903_v5  ;;  %1468 = vperm.xlu0 %2292, %v1394_v50   ;;  %v2120_v21 = vld [vmem:[%s3197_s4 + $0x40] sm:$0xff] }
 0x2aa   : > { %v1289_v38 = vmul.f32 0.5, %v1288_v18  ;;  %v1414_v18 = vld [vmem:[%s3198_s5 + $0xf0] sm:$0xff] }
 0x2ac   : > { %v1290_v22 = vsub.f32 1.5, %v1289_v38  ;;  %v2112_v38 = vld [vmem:[%s3197_s4] sm:$0xff] }
 0x2ae   : > { %v1291_v52 = vmul.f32 %v2361_v24, %v1290_v22  ;;  %v2113_v22 = vld [vmem:[%s3197_s4 + $0x8] sm:$0xff] }
 0x2b0   : > { %1326 = vxpose.xlu2.b32.cont [15/16] %v1310_v63, 128  ;;  %v1295_v25 = vsel %vm1294_vm4, %v2361_v24, %v1291_v52  ;;  %v1410_v24 = vld [vmem:[%s3198_s5 + $0xd0] sm:$0xff]  ;;  %v2121_v63 = vld [vmem:[%s3197_s4 + $0x48] sm:$0xff] }
 0x2b1   : > { %v1311_v4 = vmul.f32 %v1295_v25, %v2910_v51  ;;  %v1387_v51 = vld [vmem:[%s3198_s5 + $0x18] sm:$0xff]  ;;  %1478 = vperm.xlu0 %2292, %v1396_v55   ;;  %v2114_v52 = vld [vmem:[%s3197_s4 + $0x10] sm:$0xff] }
 0x2b2   : > { %1433 = vperm.xlu1 %2293, %v1387_v51   ;;  %v2122_v25 = vld [vmem:[%s3197_s4 + $0x50] sm:$0xff]  ;;  %v2117_v51 = vld [vmem:[%s3197_s4 + $0x28] sm:$0xff] }
 0x2b8   : > { %1327 = vxpose.xlu2.b32.end [16/16] %v1311_v4, 128  ;;  %v2115_v4 = vld [vmem:[%s3197_s4 + $0x18] sm:$0xff] }
 0x2b9   : > { %1488 = vperm.xlu0 %2292, %v1398_v0  }
 0x2ba   : > { %1443 = vperm.xlu1 %2293, %v1389_v31  }
 0x2c1   : > { %1498 = vperm.xlu0 %2292, %v1400_v27  }
 0x2c2   : > { %1453 = vperm.xlu1 %2293, %v1391_v10   ;;  %v2118_v10 = vld [vmem:[%s3197_s4 + $0x30] sm:$0xff] }
 0x2c9   : > { %1508 = vperm.xlu0 %2292, %v1402_v61  }
 0x2ca   : > { %1463 = vperm.xlu1 %2293, %v1393_v58  }
 0x2d1   : > { %1518 = vperm.xlu0 %2292, %v1404_v42  }
 0x2d2   : > { %1473 = vperm.xlu1 %2293, %v1395_v3   ;;  %v2127_v3 = vld [vmem:[%s3197_s4 + $0x78] sm:$0xff] }
 0x2d9   : > { %v1328_v41 = vpop.trf.xlu2  ;;  %1528 = vperm.xlu0 %2292, %v1406_v46  }
 0x2da   : > { %1483 = vperm.xlu1 %2293, %v1397_v47  }
 0x2e1   : > { %v1329_v29 = vpop.trf.xlu2  ;;  %1538 = vperm.xlu0 %2292, %v1408_v13  }
 0x2e2   : > { %v2948_v5 = vpack.c.bf16 %v1329_v29, %v1328_v41  ;;  %1493 = vperm.xlu1 %2293, %v1399_v57   ;;  %v2123_v41 = vld [vmem:[%s3197_s4 + $0x58] sm:$0xff]  ;;  %v2116_v29 = vld [vmem:[%s3197_s4 + $0x20] sm:$0xff] }
 0x2e9   : > { %v1330_v26 = vpop.trf.xlu2  ;;  %1548 = vperm.xlu0 %2292, %v1410_v24  }
 0x2ea   : > { %1503 = vperm.xlu1 %2293, %v1401_v59  }
 0x2f1   : > { %v1331_v30 = vpop.trf.xlu2  ;;  %1558 = vperm.xlu0 %2292, %v1412_v17  }
 0x2f2   : > { %v2956_v28 = vpack.c.bf16 %v1331_v30, %v1330_v26  ;;  %1513 = vperm.xlu1 %2293, %v1403_v60   ;;  %v2125_v30 = vld [vmem:[%s3197_s4 + $0x68] sm:$0xff] }
 0x2f6   : > { %v1424_v19 = vpop.permute.xlu1 %1423 }
 0x2f9   : > { %v1332_v32 = vpop.trf.xlu2  ;;  %1568 = vperm.xlu0 %2292, %v1414_v18  }
 0x2fa   : > { %1523 = vperm.xlu1 %2293, %v1405_v2  }
 0x2fb   : > { %v1419_v26 = vpop.permute.xlu0 %1418 }
 0x2fe   : > { %v1429_v48 = vpop.permute.xlu1 %1428 }
 0x301   : > { %v1333_v37 = vpop.trf.xlu2 }
 0x302   : > { %v2967_v16 = vpack.c.bf16 %v1333_v37, %v1332_v32  ;;  %1533 = vperm.xlu1 %2293, %v1407_v1   ;;  %v2126_v37 = vld [vmem:[%s3197_s4 + $0x70] sm:$0xff] }
 0x303   : > { %v1439_v31 = vpop.permute.xlu0 %1438 }
 0x309   : > { %v1334_v39 = vpop.trf.xlu2 }
 0x30a   : > { %1543 = vperm.xlu1 %2293, %v1409_v8  }
 0x30b   : > { %v3091_v36 = vpop.permute.xlu0 %1448 }
 0x311   : > { %v1335_v43 = vpop.trf.xlu2 }
 0x312   : > { %v1347_v45 = vpack.c.bf16 %v1335_v43, %v1334_v39  ;;  %1553 = vperm.xlu1 %2293, %v1411_v33  }
 0x313   : > { %v3101_v34 = vpop.permute.xlu0 %1458 }
 0x319   : > { %v1336_v54 = vpop.trf.xlu2 }
 0x31a   : > { %1563 = vperm.xlu1 %2293, %v1413_v44  }
 0x31b   : > { %v3105_v39 = vpop.permute.xlu0 %1468 }
 0x321   : > { %v1337_v53 = vpop.trf.xlu2 }
 0x322   : > { %1573 = vperm.xlu1 %2293, %v1415_v15   ;;  %v1348_v56 = vpack.c.bf16 %v1337_v53, %v1336_v54 }
 0x324   : > { %v1434_v11 = vpop.permute.xlu1 %1433 }
 0x329   : > { %v1338_v62 = vpop.trf.xlu2 }
 0x331   : > { %v1339_v20 = vpop.trf.xlu2 }
 0x332   : > { %v1349_v7 = vpack.c.bf16 %v1339_v20, %v1338_v62 }
 0x339   : > { %v1340_v49 = vpop.trf.xlu2 }
 0x341   : > { %v1341_v9 = vpop.trf.xlu2 }
 0x342   : > { %v1350_v14 = vpack.c.bf16 %v1341_v9, %v1340_v49 }
 0x349   : > { %v1342_v12 = vpop.trf.xlu2 }
 0x351   : > { %v1343_v6 = vpop.trf.xlu2 }
 0x352   : > { %v1351_v23 = vpack.c.bf16 %v1343_v6, %v1342_v12 }
 0x354   : > { %1672 = vmatpush.bf16.msra.mxu2 %v1351_v23  ;;  %2224 = vmatpush.bf16.msra.mxu3 %v1351_v23 }
 0x358   : > { %1673 = vmatpush.bf16.msra.mxu2 %v1350_v14  ;;  %2225 = vmatpush.bf16.msra.mxu3 %v1350_v14 }
 0x35c   : > { %1674 = vmatpush.bf16.msra.mxu2 %v1349_v7  ;;  %2226 = vmatpush.bf16.msra.mxu3 %v1349_v7 }
 0x360   : > { %1675 = vmatpush.bf16.msra.mxu2 %v1348_v56  ;;  %2227 = vmatpush.bf16.msra.mxu3 %v1348_v56 }
 0x364   : > { %1676 = vmatpush.bf16.msra.mxu2 %v1347_v45  ;;  %2228 = vmatpush.bf16.msra.mxu3 %v1347_v45  ;;  %v3115_v45 = vpop.permute.xlu0 %1478 }
 0x368   : > { %1677 = vmatpush.bf16.msra.mxu2 %v2967_v16  ;;  %2229 = vmatpush.bf16.msra.mxu3 %v2967_v16 }
 0x36c   : > { %1678 = vmatpush.bf16.msra.mxu2 %v2956_v28  ;;  %2230 = vmatpush.bf16.msra.mxu3 %v2956_v28  ;;  %v1444_v28 = vpop.permute.xlu1 %1443  ;;  %v3119_v47 = vpop.permute.xlu0 %1488 }
 0x370   : > { %1679 = vmatpush.bf16.msra.mxu2 %v2948_v5  ;;  %2231 = vmatpush.bf16.msra.mxu3 %v2948_v5  ;;  %v2124_v5 = vld [vmem:[%s3197_s4 + $0x60] sm:$0xff] }
 0x373   : > { %1680 = vmatmul.bf16.vlgmr.msra.gmra.mxu2 %v2112_v38  ;;  %1720 = vmatmul.bf16.vlgmr.msra.gmra.mxu3 %v2120_v21 }
 0x374   : > { %v3089_v32 = vpop.permute.xlu1 %1453  ;;  %v1499_v53 = vpop.permute.xlu0 %1498 }
 0x37c   : > { %v3099_v16 = vpop.permute.xlu1 %1463  ;;  %v1509_v42 = vpop.permute.xlu0 %1508 }
 0x383   : > { %1685 = vmatmul.bf16.gmra.mxu2 %v2113_v22  ;;  %1725 = vmatmul.bf16.gmra.mxu3 %v2121_v63 }
 0x384   : > { %v3103_v58 = vpop.permute.xlu1 %1473  ;;  %v1519_v24 = vpop.permute.xlu0 %1518 }
 0x38c   : > { %v3113_v43 = vpop.permute.xlu1 %1483 }
 0x393   : > { %1690 = vmatmul.bf16.gmra.mxu2 %v2114_v52  ;;  %1730 = vmatmul.bf16.gmra.mxu3 %v2122_v25 }
 0x394   : > { %v3117_v35 = vpop.permute.xlu1 %1493 }
 0x39c   : > { %v1504_v57 = vpop.permute.xlu1 %1503 }
 0x3a3   : > { %1695 = vmatmul.bf16.gmra.mxu2 %v2115_v4  ;;  %1735 = vmatmul.bf16.gmra.mxu3 %v2123_v41  ;;  %v1529_v41 = vpop.permute.xlu0 %1528 }
 0x3a4   : > { %v1514_v49 = vpop.permute.xlu1 %1513 }
 0x3ac   : > { %v1524_v7 = vpop.permute.xlu1 %1523 }
 0x3b3   : > { %1700 = vmatmul.bf16.gmra.mxu2 %v2116_v29  ;;  %1740 = vmatmul.bf16.gmra.mxu3 %v2124_v5 }
 0x3b4   : > { %v1534_v4 = vpop.permute.xlu1 %1533 }
 0x3c3   : > { %1705 = vmatmul.bf16.gmra.mxu2 %v2117_v51  ;;  %1745 = vmatmul.bf16.gmra.mxu3 %v2125_v30 }
 0x3d3   : > { %1710 = vmatmul.bf16.gmra.mxu2 %v2118_v10  ;;  %1750 = vmatmul.bf16.gmra.mxu3 %v2126_v37  ;;  %v1544_v10 = vpop.permute.xlu1 %1543  ;;  %v1539_v37 = vpop.permute.xlu0 %1538 }
 0x3e3   : > { %1715 = vmatmul.bf16.gmra.mxu2 %v2119_v40  ;;  %1755 = vmatmul.bf16.gmra.mxu3 %v2127_v3 }
 0x3f6   : > { %v1681_v54 = vpop.f32.mrf.mxu2  ;;  %v1721_v50 = vpop.f32.mrf.mxu3 }
 0x3f7   : > { %v1682_v62 = vadd.f32 %v1681_v54, %v1419_v26  ;;  %v1722_v0 = vadd.f32 %v1721_v50, %v1499_v53 }
 0x3fe   : > { %v1683_v55 = vpop.f32.mrf.mxu2  ;;  %v1723_v59 = vpop.f32.mrf.mxu3 }
 0x3ff   : > { %v1684_v60 = vadd.f32 %v1683_v55, %v1424_v19  ;;  %v1724_v20 = vadd.f32 %v1723_v59, %v1504_v57 }
 0x401   : > { %v2132_v27 = vpack.c.bf16 %v1684_v60, %v1682_v62  ;;  %v2172_v2 = vpack.c.bf16 %v1724_v20, %v1722_v0  ;;  %v1554_v62 = vpop.permute.xlu1 %1553  ;;  %v1549_v0 = vpop.permute.xlu0 %1548 }
 0x403   : > { %2133 = vst [vmem:[%s3124_s28] sm:$0xff] %v2132_v27  }
 0x404   : > { %2216 = vst [vmem:[%s3124_s28 + $0x40] sm:$0xff] %v2172_v2  }
 0x406   : > { %v1686_v61 = vpop.f32.mrf.mxu2  ;;  %v1726_v1 = vpop.f32.mrf.mxu3 }
 0x407   : > { %v1687_v46 = vadd.f32 %v1686_v61, %v1429_v48  ;;  %v1727_v33 = vadd.f32 %v1726_v1, %v1509_v42 }
 0x40e   : > { %v1688_v8 = vpop.f32.mrf.mxu2  ;;  %v1728_v9 = vpop.f32.mrf.mxu3 }
 0x40f   : > { %v1689_v12 = vadd.f32 %v1688_v8, %v1434_v11  ;;  %v1729_v6 = vadd.f32 %v1728_v9, %v1514_v49  ;;  %v1564_v8 = vpop.permute.xlu1 %1563  ;;  %v1559_v9 = vpop.permute.xlu0 %1558 }
 0x411   : > { %v2137_v23 = vpack.c.bf16 %v1689_v12, %v1687_v46  ;;  %v2177_v13 = vpack.c.bf16 %v1729_v6, %v1727_v33 }
 0x413   : > { %2209 = vst [vmem:[%s3124_s28 + $0x8] sm:$0xff] %v2137_v23  }
 0x414   : > { %2217 = vst [vmem:[%s3124_s28 + $0x48] sm:$0xff] %v2177_v13  }
 0x416   : > { %v1691_v44 = vpop.f32.mrf.mxu2  ;;  %v1731_v14 = vpop.f32.mrf.mxu3 }
 0x417   : > { %v1692_v17 = vadd.f32 %v1691_v44, %v1439_v31  ;;  %v1732_v18 = vadd.f32 %v1731_v14, %v1519_v24 }
 0x41e   : > { %v1693_v15 = vpop.f32.mrf.mxu2  ;;  %v1733_v56 = vpop.f32.mrf.mxu3 }
 0x41f   : > { %v1694_v38 = vadd.f32 %v1693_v15, %v1444_v28  ;;  %v1734_v21 = vadd.f32 %v1733_v56, %v1524_v7  ;;  %v1574_v7 = vpop.permute.xlu1 %1573 }
 0x421   : > { %v2142_v22 = vpack.c.bf16 %v1694_v38, %v1692_v17  ;;  %v2182_v63 = vpack.c.bf16 %v1734_v21, %v1732_v18 }
 0x423   : > { %2210 = vst [vmem:[%s3124_s28 + $0x10] sm:$0xff] %v2142_v22  }
 0x424   : > { %2218 = vst [vmem:[%s3124_s28 + $0x50] sm:$0xff] %v2182_v63  }
 0x426   : > { %v1696_v52 = vpop.f32.mrf.mxu2  ;;  %v1736_v25 = vpop.f32.mrf.mxu3 }
 0x427   : > { %v1697_v29 = vadd.f32 %v1696_v52, %v3091_v36  ;;  %v1737_v5 = vadd.f32 %v1736_v25, %v1529_v41 }
 0x42e   : > { %v1698_v19 = vpop.f32.mrf.mxu2  ;;  %v1738_v48 = vpop.f32.mrf.mxu3 }
 0x42f   : > { %v1699_v11 = vadd.f32 %v1698_v19, %v3089_v32  ;;  %v1739_v26 = vadd.f32 %v1738_v48, %v1534_v4 }
 0x431   : > { %v2147_v51 = vpack.c.bf16 %v1699_v11, %v1697_v29  ;;  %v2187_v30 = vpack.c.bf16 %v1739_v26, %v1737_v5 }
 0x433   : > { %2211 = vst [vmem:[%s3124_s28 + $0x18] sm:$0xff] %v2147_v51  }
 0x434   : > { %2219 = vst [vmem:[%s3124_s28 + $0x58] sm:$0xff] %v2187_v30  }
 0x436   : > { %v1701_v28 = vpop.f32.mrf.mxu2  ;;  %v1741_v31 = vpop.f32.mrf.mxu3 }
 0x437   : > { %v1702_v54 = vadd.f32 %v1701_v28, %v3101_v34  ;;  %v1742_v50 = vadd.f32 %v1741_v31, %v1539_v37 }
 0x43e   : > { %v1703_v40 = vpop.f32.mrf.mxu2  ;;  %v1743_v3 = vpop.f32.mrf.mxu3 }
 0x43f   : > { %v1704_v36 = vadd.f32 %v1703_v40, %v3099_v16  ;;  %v1744_v57 = vadd.f32 %v1743_v3, %v1544_v10 }
 0x441   : > { %v2152_v32 = vpack.c.bf16 %v1704_v36, %v1702_v54  ;;  %v2192_v53 = vpack.c.bf16 %v1744_v57, %v1742_v50 }
 0x443   : > { %2212 = vst [vmem:[%s3124_s28 + $0x20] sm:$0xff] %v2152_v32  }
 0x444   : > { %2220 = vst [vmem:[%s3124_s28 + $0x60] sm:$0xff] %v2192_v53  }
 0x446   : > { %v1706_v55 = vpop.f32.mrf.mxu2  ;;  %v1746_v59 = vpop.f32.mrf.mxu3 }
 0x447   : > { %v1707_v27 = vadd.f32 %v1706_v55, %v3105_v39  ;;  %v1747_v2 = vadd.f32 %v1746_v59, %v1549_v0 }
 0x44e   : > { %v1708_v60 = vpop.f32.mrf.mxu2  ;;  %v1748_v20 = vpop.f32.mrf.mxu3 }
 0x44f   : > { %v1709_v34 = vadd.f32 %v1708_v60, %v3103_v58  ;;  %v1749_v61 = vadd.f32 %v1748_v20, %v1554_v62 }
 0x451   : > { %v2157_v16 = vpack.c.bf16 %v1709_v34, %v1707_v27  ;;  %v2197_v1 = vpack.c.bf16 %v1749_v61, %v1747_v2 }
 0x453   : > { %2213 = vst [vmem:[%s3124_s28 + $0x28] sm:$0xff] %v2157_v16  }
 0x454   : > { %2221 = vst [vmem:[%s3124_s28 + $0x68] sm:$0xff] %v2197_v1  }
 0x456   : > { %v1711_v49 = vpop.f32.mrf.mxu2  ;;  %v1751_v42 = vpop.f32.mrf.mxu3 }
 0x457   : > { %v1712_v12 = vadd.f32 %v1711_v49, %v3115_v45  ;;  %v1752_v39 = vadd.f32 %v1751_v42, %v1559_v9  ;;  %v1569_v45 = vpop.permute.xlu0 %1568 }
 0x45e   : > { %v1713_v46 = vpop.f32.mrf.mxu2  ;;  %v1753_v33 = vpop.f32.mrf.mxu3 }
 0x45f   : > { %v1714_v58 = vadd.f32 %v1713_v46, %v3113_v43  ;;  %v1754_v6 = vadd.f32 %v1753_v33, %v1564_v8 }
 0x461   : > { %v2162_v23 = vpack.c.bf16 %v1714_v58, %v1712_v12  ;;  %v2202_v13 = vpack.c.bf16 %v1754_v6, %v1752_v39 }
 0x463   : > { %2214 = vst [vmem:[%s3124_s28 + $0x30] sm:$0xff] %v2162_v23  }
 0x464   : > { %2222 = vst [vmem:[%s3124_s28 + $0x70] sm:$0xff] %v2202_v13  }
 0x466   : > { %v1716_v44 = vpop.f32.mrf.mxu2  ;;  %v1756_v14 = vpop.f32.mrf.mxu3 }
 0x467   : > { %v1717_v43 = vadd.f32 %v1716_v44, %v3119_v47  ;;  %v1757_v56 = vadd.f32 %v1756_v14, %v1569_v45 }
 0x46e   : > { %v1718_v24 = vpop.f32.mrf.mxu2  ;;  %v1758_v15 = vpop.f32.mrf.mxu3 }
 0x46f   : > { %v1719_v17 = vadd.f32 %v1718_v24, %v3117_v35  ;;  %v1759_v18 = vadd.f32 %v1758_v15, %v1574_v7 }
 0x471   : > { %v2167_v38 = vpack.c.bf16 %v1719_v17, %v1717_v43  ;;  %v2207_v21 = vpack.c.bf16 %v1759_v18, %v1757_v56 }
 0x473   : > { %2215 = vst [vmem:[%s3124_s28 + $0x38] sm:$0xff] %v2167_v38  }
 0x474   : > { %2223 = vst [vmem:[%s3124_s28 + $0x78] sm:$0xff] %v2207_v21  }
 0x475   : > { %2389 = shalt.err (!%p2386_p5)
}
 0x476   : > { %s2445_s20 = smov 4  }
 0x477   : > { %2233 = dma.vmem_to_hbm [thread:$0]  (%p2521_p4), %s1840_s13, 2048, %s1842_s24, %s1826_s14, %s2442_s8, %s2442_s8, %s2445_s20  }
 0x478 PF: > { %p2239_p6 = scmp.ge.s32.totalorder %s2440_s26, 2  ;;  %s1856_s28 = sand.u32 1, %s2420_s21  }
 0x479   : > { %s1857_s11 = scalar_lea.sflag [#allocation3], %s1856_s28 }
 0x47a   : > { %p2236_p7 = pnand %p2239_p6, %p2528_p8 }
 0x47c   : > { %p2237_p9 = pneg %p2236_p7 }
 0x47e   : > { %2415 = dma.done.wait (%p2237_p9), %s1857_s11, 2048  }
 0x47f   : > { %2417 = vsyncadd (%p2237_p9), %s1857_s11, 4294965248  ;;  %s19_s26 = sadd.s32 1, %s2440_s26   ;;  %s3202_s21 = smov %s2424_s22 }
 0x480   : > { %p16_p10 = scmp.ge.s32.totalorder %s19_s26, 4   ;;  %s3203_s22 = smov %s2428_s23 }
 0x481   : > { %s3204_s23 = smov %s2534_s10  ;;  %s3205_s24 = smov %s2436_s25 }
 0x482   : > { %s3206_s25 = smov %s3208_s29  ;;  %18 = sbr.rel (!%p16_p10) target bundleno = 4 (0x4), region = 80 }
 0x487   :  { %1863 = vsyncpa [#allocation3], 1 }
 0x488   :  { %1865 = vsyncpa [#allocation3 + $0x1], 1 }

</bundles_post_ra>
